<compile_context>
chip_gen: v7x
topology: tpu7x:2x2x1
jax: 0.10.0
libtpu: 0.0.40
codegen_flags: <defaults>
</compile_context>

<pallas_src>
import jax
import jax.numpy as jnp
from jax import lax
from jax.experimental import pallas as pl
from jax.experimental.pallas import tpu as pltpu


def _round_up(x, m):
    return ((x + m - 1) // m) * m


# ----------------------------------------------------------------------------
# Kernels
# ----------------------------------------------------------------------------
# contract activation dim-1 with weight dim-0 (weight pre-transposed to [in, out])
_DN = (((1,), (0,)), ((), ()))


def _fusion_concat_kernel(t5_ref, tb_ref, w1_ref, w2_ref, b_ref, o_ref):
    # In-kernel bf16 cast (VPU) -> HBM only sees the f32 activations once.
    a = t5_ref[...].astype(w1_ref.dtype)
    b = tb_ref[...].astype(w2_ref.dtype)
    # Two back-to-back MXU matmuls, f32 accumulation; bias add after both dots
    # (keeps the vmatmul issue path clean on v5e where this tile is MXU-bound).
    acc = lax.dot_general(a, w1_ref[...], _DN, preferred_element_type=jnp.float32)
    acc = acc + lax.dot_general(b, w2_ref[...], _DN,
                                preferred_element_type=jnp.float32)
    o_ref[...] = (acc + b_ref[...]).astype(o_ref.dtype)


def _fusion_sum_kernel(t5_ref, tb_ref, o_ref):
    o_ref[...] = t5_ref[...] + tb_ref[...]


# ----------------------------------------------------------------------------
# One-time parameter preparation (do this at model init, not per call)
# ----------------------------------------------------------------------------
def prepare_fusion_params(weight, bias, compute_dtype=jnp.bfloat16):
    """Split nn.Linear(2H, H).weight ([out, in]) into two [in, out] bf16 tiles
    and an f32 [1, H] bias.  One-time cost; cache the result across calls so
    the per-call kernel streams only activations + cached bf16 weights."""
    H = weight.shape[0]
    w1t = weight[:, :H].T.astype(compute_dtype)   # [H_in, H_out]
    w2t = weight[:, H:].T.astype(compute_dtype)   # [H_in, H_out]
    b2d = bias.astype(jnp.float32).reshape(1, H)
    return w1t, w2t, b2d


# ----------------------------------------------------------------------------
# Wrappers
# ----------------------------------------------------------------------------
def fusion_concat(t5_repr, tb_repr, w1t, w2t, bias2d, *, tile_m=512,
                  tile_n=384, out_dtype=jnp.bfloat16):
    """concat([t5, tb], -1) @ W^T + b as two split bf16 matmuls on the MXU.

    t5_repr, tb_repr: [B, S, H] (f32; cast to bf16 inside the kernel)
    w1t, w2t:         [H, H]  (pre-transposed bf16, from prepare_fusion_params)
    bias2d:           [1, H]  (f32)
    returns:          [B, S, H] in out_dtype (bf16 by default: precision is
                      already bf16-operand-limited, and it halves writeback)
    """
    B, S, H = t5_repr.shape
    M = B * S

    t5_2d = t5_repr.reshape(M, H)
    tb_2d = tb_repr.reshape(M, H)

    # M tile: 16-row aligned (bf16 output sublane packing); no jnp.pad --
    # cdiv grid + Pallas edge-block masking handles non-divisible M, and K is
    # always fully in-bounds so garbage rows only hit masked-out output rows.
    tm = min(tile_m, _round_up(M, 16))
    # N split over output columns: gives both v7x TensorCores a program even
    # for the single-M-tile real shapes, and shards the resident weight.
    tn = tile_n if (H % tile_n == 0) else H
    grid = (pl.cdiv(M, tm), H // tn)

    out = pl.pallas_call(
        _fusion_concat_kernel,
        out_shape=jax.ShapeDtypeStruct((M, H), out_dtype),
        grid_spec=pltpu.PrefetchScalarGridSpec(
            num_scalar_prefetch=0,
            grid=grid,
            in_specs=[
                pl.BlockSpec((tm, H), lambda i, j: (i, 0)),   # t5 rows (f32)
                pl.BlockSpec((tm, H), lambda i, j: (i, 0)),   # tb rows (f32)
                pl.BlockSpec((H, tn), lambda i, j: (0, j)),   # W1^T col-slab
                pl.BlockSpec((H, tn), lambda i, j: (0, j)),   # W2^T col-slab
                pl.BlockSpec((1, tn), lambda i, j: (0, j)),   # bias (f32)
            ],
            out_specs=pl.BlockSpec((tm, tn), lambda i, j: (i, j)),
        ),
        compiler_params=pltpu.CompilerParams(
            dimension_semantics=("parallel", "parallel")),
    )(t5_2d, tb_2d, w1t, w2t, bias2d)

    return out.reshape(B, S, H)


def fusion_sum(t5_repr, tb_repr, *, tile_m=512):
    """Elementwise sum fusion: t5 + tb, [B, S, H] -> [B, S, H].

    M-tiled so the (pure-bandwidth) op streams through VMEM with
    double-buffered DMA.  512-row default tile keeps 3 f32 arrays x 2 buffers
    under v5e's 16 MiB default scoped VMEM while staying near HBM roofline.
    """
    B, S, H = t5_repr.shape
    M = B * S
    out_dtype = t5_repr.dtype

    t5_2d = t5_repr.reshape(M, H)
    tb_2d = tb_repr.reshape(M, H)

    tm = min(tile_m, _round_up(M, 16))
    grid = (pl.cdiv(M, tm),)

    out = pl.pallas_call(
        _fusion_sum_kernel,
        out_shape=jax.ShapeDtypeStruct((M, H), out_dtype),
        grid_spec=pltpu.PrefetchScalarGridSpec(
            num_scalar_prefetch=0,
            grid=grid,
            in_specs=[
                pl.BlockSpec((tm, H), lambda i: (i, 0)),
                pl.BlockSpec((tm, H), lambda i: (i, 0)),
            ],
            out_specs=pl.BlockSpec((tm, H), lambda i: (i, 0)),
        ),
        compiler_params=pltpu.CompilerParams(
            dimension_semantics=("parallel",)),
    )(t5_2d, tb_2d)

    return out.reshape(B, S, H)


def mask_labels(labels, pad_token_id):
    """labels[labels == pad_token_id] = -100 on a tiny [B, T-1] int tensor.

    Plain JAX by design: XLA fuses the `where`; a Pallas launch for a (2, 7)
    int32 block would be pure fixed-cost overhead (masked sub-vreg stores).
    """
    labels = labels.astype(jnp.int32)
    return jnp.where(labels == jnp.int32(pad_token_id), jnp.int32(-100), labels)


# ----------------------------------------------------------------------------
# CustomModel fusion forward (JAX glue around the kernels)
# ----------------------------------------------------------------------------
def custom_model_fusion_forward(t5_final_repr, tb_final_repr, fusion_params,
                                target_ids, pad_token_id,
                                fusion_mode="concat"):
    w1t, w2t, b2d = fusion_params
    if fusion_mode == "concat":
        updated_repr = fusion_concat(t5_final_repr, tb_final_repr, w1t, w2t, b2d)
    elif fusion_mode == "sum":
        updated_repr = fusion_sum(t5_final_repr, tb_final_repr)
    else:
        updated_repr = t5_final_repr

    # training-branch glue: decoder_input_ids / masked labels
    decoder_input_ids = target_ids[:, :-1]
    labels = mask_labels(target_ids[:, 1:], pad_token_id)
    # TODO(synk): outputs = t5_model(encoder_outputs=..., decoder_input_ids=...,
    #             labels=...) needs the full pretrained T5 decoder; not kernelized.
    return updated_repr, decoder_input_ids, labels


# ----------------------------------------------------------------------------
# Main
# ----------------------------------------------------------------------------
if __name__ == "__main__":
    key = jax.random.PRNGKey(0)
    B, S, H = 2, 8, 768          # hidden_size = 768 as in the module
    T = 8                        # target sequence length
    PAD_ID = 0

    k1, k2, k3, k4, k5 = jax.random.split(key, 5)
    t5_repr = jax.random.normal(k1, (B, S, H), dtype=jnp.float32)
    tb_repr = jax.random.normal(k2, (B, S, H), dtype=jnp.float32)
    # nn.Linear(2H, H): weight [H, 2H], bias [H]
    mlp_weight = jax.random.normal(k3, (H, 2 * H), dtype=jnp.float32) * 0.02
    mlp_bias = jax.random.normal(k4, (H,), dtype=jnp.float32) * 0.02
    target_ids = jax.random.randint(k5, (B, T), 0, 32, dtype=jnp.int32)

    # one-time ("model init") weight preparation, cached across forward calls
    fusion_params = prepare_fusion_params(mlp_weight, mlp_bias)
    fusion_params = jax.block_until_ready(fusion_params)

    updated, dec_in, labels = custom_model_fusion_forward(
        t5_repr, tb_repr, fusion_params, target_ids, PAD_ID,
        fusion_mode="concat")
    updated = jax.block_until_ready(updated)
    labels = jax.block_until_ready(labels)

    # also exercise the 'sum' fusion path
    summed = jax.block_until_ready(fusion_sum(t5_repr, tb_repr))

    # pure-JAX (f32) references
    ref_concat = (jnp.concatenate([t5_repr, tb_repr], axis=-1)
                  @ mlp_weight.T + mlp_bias)
    ref_sum = t5_repr + tb_repr
    ref_labels = jnp.where(target_ids[:, 1:] == PAD_ID, -100,
                           target_ids[:, 1:])

    # bf16 operands + bf16 output vs f32 reference -> modest tolerance
    assert jnp.allclose(updated.astype(jnp.float32), ref_concat,
                        atol=5e-2, rtol=5e-2)
    assert jnp.allclose(summed, ref_sum)
    assert jnp.array_equal(labels, ref_labels)
    assert dec_in.shape == (B, T - 1)
    assert updated.dtype == jnp.bfloat16 and updated.shape == (B, S, H)

    # exercise the cdiv-grid edge-masking path (M not tile-aligned, grid=(2,2))
    B2, S2 = 2, 24                                   # M = 48
    t5_r = jax.random.normal(k1, (B2, S2, H), dtype=jnp.float32)
    tb_r = jax.random.normal(k2, (B2, S2, H), dtype=jnp.float32)
    w1t, w2t, b2d = fusion_params
    out_r = jax.block_until_ready(
        fusion_concat(t5_r, tb_r, w1t, w2t, b2d, tile_m=32, tile_n=384))
    sum_r = jax.block_until_ready(fusion_sum(t5_r, tb_r, tile_m=32))
    ref_r = jnp.concatenate([t5_r, tb_r], axis=-1) @ mlp_weight.T + mlp_bias
    assert jnp.allclose(out_r.astype(jnp.float32), ref_r, atol=5e-2, rtol=5e-2)
    assert jnp.allclose(sum_r, t5_r + tb_r)

    # f32-output variant (if the downstream decoder wants f32)
    out_f32 = jax.block_until_ready(
        fusion_concat(t5_repr, tb_repr, w1t, w2t, b2d, out_dtype=jnp.float32))
    assert out_f32.dtype == jnp.float32
    assert jnp.allclose(out_f32, ref_concat, atol=3e-2, rtol=3e-2)

    print("KERNEL_OK")
</pallas_src>

<mosaic_0001>
module attributes {stable_mosaic.version = 11 : i64} {
  func.func @_fusion_concat_kernel(%arg0: i32, %arg1: i32, %arg2: memref<16x768xf32, #tpu.memory_space<vmem>>, %arg3: memref<16x768xf32, #tpu.memory_space<vmem>>, %arg4: memref<768x384xbf16, #tpu.memory_space<vmem>>, %arg5: memref<768x384xbf16, #tpu.memory_space<vmem>>, %arg6: memref<1x384xf32, #tpu.memory_space<vmem>>, %arg7: memref<16x384xbf16, #tpu.memory_space<vmem>>) attributes {dimension_semantics = [#tpu.dimension_semantics<parallel>, #tpu.dimension_semantics<parallel>], iteration_bounds = array<i64: 1, 2>, scalar_prefetch = 0 : i64, scratch_operands = 0 : i64, tpu.core_type = #tpu.core_type<tc>, window_params = [{transform_indices = @transform_0, window_bounds = array<i64: 16, 768>}, {transform_indices = @transform_1, window_bounds = array<i64: 16, 768>}, {transform_indices = @transform_2, window_bounds = array<i64: 768, 384>}, {transform_indices = @transform_3, window_bounds = array<i64: 768, 384>}, {transform_indices = @transform_4, window_bounds = array<i64: 1, 384>}, {transform_indices = @transform_5, window_bounds = array<i64: 16, 384>}]} {
    %c0 = arith.constant 0 : index
    %c0_0 = arith.constant 0 : index
    %0 = vector.load %arg2[%c0, %c0_0] : memref<16x768xf32, #tpu.memory_space<vmem>>, vector<16x768xf32>
    %1 = arith.truncf %0 : vector<16x768xf32> to vector<16x768xbf16>
    %c0_1 = arith.constant 0 : index
    %c0_2 = arith.constant 0 : index
    %2 = vector.load %arg3[%c0_1, %c0_2] : memref<16x768xf32, #tpu.memory_space<vmem>>, vector<16x768xf32>
    %3 = arith.truncf %2 : vector<16x768xf32> to vector<16x768xbf16>
    %c0_3 = arith.constant 0 : index
    %c0_4 = arith.constant 0 : index
    %4 = vector.load %arg4[%c0_3, %c0_4] : memref<768x384xbf16, #tpu.memory_space<vmem>>, vector<768x384xbf16>
    %cst = arith.constant dense<0.000000e+00> : vector<16x384xf32>
    %5 = tpu.matmul %1, %4, %cst {dimension_numbers = #tpu.dot_dimension_numbers<[1], [0], [0], [1], [0, 0, 1, 1], [], []>} : vector<16x768xbf16>, vector<768x384xbf16>, vector<16x384xf32> -> vector<16x384xf32>
    %c0_5 = arith.constant 0 : index
    %c0_6 = arith.constant 0 : index
    %6 = vector.load %arg5[%c0_5, %c0_6] : memref<768x384xbf16, #tpu.memory_space<vmem>>, vector<768x384xbf16>
    %cst_7 = arith.constant dense<0.000000e+00> : vector<16x384xf32>
    %7 = tpu.matmul %3, %6, %cst_7 {dimension_numbers = #tpu.dot_dimension_numbers<[1], [0], [0], [1], [0, 0, 1, 1], [], []>} : vector<16x768xbf16>, vector<768x384xbf16>, vector<16x384xf32> -> vector<16x384xf32>
    %8 = arith.addf %5, %7 : vector<16x384xf32>
    %c0_8 = arith.constant 0 : index
    %c0_9 = arith.constant 0 : index
    %9 = vector.load %arg6[%c0_8, %c0_9] : memref<1x384xf32, #tpu.memory_space<vmem>>, vector<1x384xf32>
    %10 = vector.broadcast %9 : vector<1x384xf32> to vector<16x384xf32>
    %11 = arith.addf %8, %10 : vector<16x384xf32>
    %12 = arith.truncf %11 : vector<16x384xf32> to vector<16x384xbf16>
    %c0_10 = arith.constant 0 : index
    %c0_11 = arith.constant 0 : index
    %13 = vector.load %arg7[%c0_10, %c0_11] : memref<16x384xbf16, #tpu.memory_space<vmem>>, vector<16x384xbf16>
    tpu.vector_store %arg7[%c0_10, %c0_11], %12 {strides = array<i32>} : memref<16x384xbf16, #tpu.memory_space<vmem>>, vector<16x384xbf16>,
    return
  }
  func.func @transform_0(%arg0: i32, %arg1: i32) -> (i32, i32) {
    %c0_i32 = arith.constant 0 : i32
    %c0_i32_0 = arith.constant 0 : i32
    return %arg0, %c0_i32 : i32, i32
  }
  func.func @transform_1(%arg0: i32, %arg1: i32) -> (i32, i32) {
    %c0_i32 = arith.constant 0 : i32
    %c0_i32_0 = arith.constant 0 : i32
    return %arg0, %c0_i32 : i32, i32
  }
  func.func @transform_2(%arg0: i32, %arg1: i32) -> (i32, i32) {
    %c0_i32 = arith.constant 0 : i32
    %c0_i32_0 = arith.constant 0 : i32
    return %c0_i32, %arg1 : i32, i32
  }
  func.func @transform_3(%arg0: i32, %arg1: i32) -> (i32, i32) {
    %c0_i32 = arith.constant 0 : i32
    %c0_i32_0 = arith.constant 0 : i32
    return %c0_i32, %arg1 : i32, i32
  }
  func.func @transform_4(%arg0: i32, %arg1: i32) -> (i32, i32) {
    %c0_i32 = arith.constant 0 : i32
    %c0_i32_0 = arith.constant 0 : i32
    return %c0_i32, %arg1 : i32, i32
  }
  func.func @transform_5(%arg0: i32, %arg1: i32) -> (i32, i32) {
    %c0_i32 = arith.constant 0 : i32
    return %arg0, %arg1 : i32, i32
  }
}

</mosaic_0001>

<bundles_post_ra>
// kernel: tpu_custom_call.1
= control target key start
LH: loop header
LB: loop body
LE: loop exit
PB: predicated region body
PF: predicated region fallthrough
CT: control target
= control target key end

     0   :  { %s4973_s0 = inlined_call_operand.hbm [shape: f32[16,768], index: 0, kind: input, shape index: {}]   ;;  %s4974_s1 = inlined_call_operand.hbm [shape: f32[16,768], index: 1, kind: input, shape index: {}]   ;;  %s4975_s2 = inlined_call_operand.hbm [shape: bf16[768,768], index: 2, kind: input, shape index: {}]   ;;  %s4976_s3 = inlined_call_operand.hbm [shape: bf16[768,768], index: 3, kind: input, shape index: {}]   ;;  %s4977_s4 = inlined_call_operand.hbm [shape: f32[1,768], index: 4, kind: input, shape index: {}]   ;;  %s4978_s5 = inlined_call_operand.hbm [shape: bf16[16,768], index: 5, kind: output, shape index: {}]  }
   0x1   :  { %4999 = sst [smem:[#allocation20_spill]] %s4973_s0 }
   0x2   :  { %5000 = sst [smem:[#allocation21_spill]] %s4975_s2 }
   0x3   :  { %5001 = sst [smem:[#allocation22_spill]] %s4976_s3 }
   0x4   :  { %10 = vsyncpa [#allocation3], 0 }
   0x5   :  { %11 = vsyncpa [#allocation6], 0 }
   0x6   :  { %12 = vsyncpa [#allocation4], 0 }
   0x7   :  { %14 = vsyncpa [#allocation4 + $0x1], 0  ;;  %s4293_s18 = smov 0   ;;  %s4295_s19 = smov 0  }
   0x8   :  { %s4297_s20 = smov 0   ;;  %s4299_s21 = smov 0  }
   0x9   :  { %s4301_s22 = smov 0   ;;  %s4303_s23 = smov 0  }
   0xa LB: > { %5002 = sst [smem:[#allocation15_spill]] %s4227_s18  ;;  %s4324_s24 = sadd.s32 4294967295, %s4247_s23   ;;  %s4247_s23 = sphi %s4303_s23, %s20_s23   ;;  %s4243_s22 = sphi %s4301_s22, %s5048_s22   ;;  %s4239_s21 = sphi %s4299_s21, %s5047_s21   ;;  %s4235_s20 = sphi %s4297_s20, %s5046_s20   ;;  %s4231_s19 = sphi %s4295_s19, %s5045_s19   ;;  %s4227_s18 = sphi %s4293_s18, %s5044_s18  }
   0xb   : > { %5003 = sst [smem:[#allocation16_spill]] %s4247_s23  ;;  %s3054_s25 = sadd.s32 4294967294, %s4247_s23  }
   0xc   : > { %p98_p0 = scmp.ne.s32.totalorder %s4235_s20, %s4231_s19  ;;  %p99_p1 = scmp.eq.s32.totalorder %s4247_s23, 0 }
   0xd   : > { %p104_p2 = scmp.ne.s32.totalorder %s4231_s19, %s4227_s18  ;;  %p4979_p3 = scmp.eq.s32.totalorder %s4324_s24, 0 }
   0xe   : > { %p182_p4 = scmp.eq.s32.totalorder %s4324_s24, 1  ;;  %p4335_p5 = por %p99_p1, %p98_p0 }
   0xf   : > { %p188_p6 = scmp.eq.s32.totalorder %s3054_s25, 1  ;;  %p4341_p7 = por %p4979_p3, %p104_p2 }
  0x10   : > { %p4345_p8 = por %p182_p4, %p98_p0  ;;  %p3055_p10 = scmp.ge.s32.totalorder %s4247_s23, 1 }
  0x11   : > { %s5005_s28 = scalar_select %p4341_p7, 1, 0 }
  0x12   : > { %s5006_s29 = scalar_select %p4345_p8, 1, 0 }
  0x13   : > { %p4349_p9 = por %p188_p6, %p104_p2  ;;  %p195_p11 = scmp.lt.s32.totalorder %s4247_s23, 3 }
  0x14   : > { %s4249_s7 = smov [#allocation2]   ;;  %p3565_p1 = scmp.lt.s32.totalorder %s4247_s23, 2 }
  0x15   : > { %s5007_s30 = scalar_select %p4349_p9, 1, 0 }
  0x16   : > { %p4355_p12 = pnand %p3055_p10, %p195_p11  ;;  %s211_s8 = sshll.u32 %s4249_s7, 4  ;;  %s4359_s8 = int_to_ptr.vmem [resolvable:$true] %s211_s8 }
  0x17   : > { %5008 = sst [smem:[#allocation17_spill]] %s5007_s30  ;;  %p4373_p4 = pnand %p3565_p1, %p4335_p5 }
  0x18   : > { %s5009_s6 = scalar_select %p4355_p12, 1, 0 }
  0x19   : > { %p3542_p13 = pneg %p4355_p12  ;;  %s29_s11 = sadd.s32 1, %s4243_s22 }
  0x1a   : > { %s5011_s10 = scalar_select %p4373_p4, 1, 0 }
  0x1b   : > { %p4367_p2 = pnand %p3542_p13, %p4979_p3  ;;  %p4378_p6 = scmp.ge.s32.totalorder %s29_s11, 2 }
  0x1c   : > { %s5013_s0 = sld [smem:[#allocation20_spill]] }
  0x1d   : > { %s5010_s9 = scalar_select %p4367_p2, 1, 0 }
  0x1e   : > { %p4989_p11 = pneg %p4367_p2 }
  0x22   : > { %s4011_s15 = scalar_lea.hbm %s5013_s0, 1536 }
  0x23   : > { %p4012_p10 = scmp.ne.s32.totalorder %s5013_s0, %s4011_s15  ;;  %p4018_p1 = scmp.lt.u32.totalorder %s4011_s15, %s5013_s0 }
  0x25   : > { %p4014_p5 = pnand %p4989_p11, %p4012_p10 }
  0x27   : > { %p4015_p13 = pneg %p4014_p5 }
  0x29   : > { %p4020_p0 = pnand %p4018_p1, %p4015_p13 }
  0x2b   : > { %4023 = shalt.err (!%p4020_p0)
}
  0x2c   : > { %s4024_s7 = scalar_lea.vmem %s4359_s8, 1536  ;;  %p4032_p7 = scmp.lt.s32.totalorder %s4359_s8, %s4359_s8 }
  0x2d   : > { %p4025_p3 = scmp.ne.s32.totalorder %s4359_s8, %s4024_s7  ;;  %p4033_p10 = scmp.lt.s32.totalorder %s4024_s7, %s4024_s7 }
  0x2f   : > { %p4027_p9 = pnand %p4025_p3, %p4989_p11  ;;  %p4034_p5 = por %p4033_p10, %p4032_p7 }
  0x31   : > { %p4028_p8 = pneg %p4027_p9 }
  0x33   : > { %p4035_p12 = pnand %p4034_p5, %p4028_p8 }
  0x35   : > { %4038 = shalt.err (!%p4035_p12)
}
  0x36   : > { %s4985_s13 = smov 768   ;;  %s4986_s14 = smov 48  }
  0x37   : > { %3545 = dma.hbm_to_vmem [thread:$0]  (!%p4367_p2), %s5013_s0, 1536, %s4359_s8, [#allocation3], %s4985_s13, %s4985_s13, %s4986_s14  }
  0x38   : > { %s242_s17 = sand.u32 1, %s4247_s23   ;;  %s5050_s11 = smov (%p4378_p6, %s29_s11), 0 }
  0x39   : > { %5014 = sst [smem:[#allocation18_spill]] %s5050_s11  ;;  %s4987_s25 = sand.u32 1, %s4235_s20  }
  0x3a   : > { %s88_s27 = ssub.s32 %s4243_s22, %s5050_s11  ;;  %s4422_s7 = smul.u32 1152, %s4987_s25 }
  0x3b   : > { %p89_p3 = scmp.eq.s32.totalorder %s88_s27, 0  ;;  %s4988_s26 = smul.u32 192, %s4243_s22 }
  0x3c   : > { %s5015_s30 = sadd.s32 1, %s4235_s20  ;;  %s5017_s2 = sld [smem:[#allocation21_spill]] }
  0x3d   : > { %s4428_s18 = scalar_select %p89_p3, %s4235_s20, %s5015_s30  }
  0x3e   : > { %s246_s12 = scalar_lea.vmem [#allocation7], %s4422_s7  ;;  %s4440_s14 = scalar_lea.sflag [#allocation3], %s242_s17 }
  0x3f   : > { %5016 = sst [smem:[#allocation19_spill]] %s4428_s18  ;;  %s253_s13 = sshll.u32 %s246_s12, 4  ;;  %s4438_s13 = int_to_ptr.vmem [resolvable:$true] %s253_s13 }
  0x40   : > { %p4446_p8 = pneg %p4373_p4 }
  0x42   : > { %s4435_s16 = scalar_lea.hbm %s5017_s2, %s4988_s26  ;;  %s4044_s25 = scalar_lea.hbm %s5017_s2, 36864 }
  0x43   : > { %s4039_s27 = scalar_lea.hbm %s4435_s16, 18432  ;;  %p4045_p0 = scmp.lt.u32.totalorder %s4435_s16, %s5017_s2 }
  0x44   : > { %p4040_p7 = scmp.ne.s32.totalorder %s4435_s16, %s4039_s27  ;;  %p4046_p6 = scmp.lt.u32.totalorder %s4044_s25, %s4039_s27 }
  0x45   : > { %s5018_s30 = scalar_select %p4446_p8, 1, 0 }
  0x46   : > { %p4042_p9 = pnand %p4446_p8, %p4040_p7  ;;  %p4047_p13 = por %p4046_p6, %p4045_p0 }
  0x47   : > { %p4048_p1 = scmp.lt.u32.totalorder %s4039_s27, %s4435_s16 }
  0x48   : > { %p4043_p12 = pneg %p4042_p9 }
  0x49   : > { %p4049_p10 = por %p4048_p1, %p4047_p13 }
  0x4b   : > { %p4050_p5 = pnand %p4049_p10, %p4043_p12 }
  0x4d   : > { %4053 = shalt.err (!%p4050_p5)
}
  0x4e   : > { %s4054_s17 = scalar_lea.vmem %s4438_s13, 18432  ;;  %s4252_s15 = smov [#allocation7]  }
  0x4f   : > { %p4055_p3 = scmp.ne.s32.totalorder %s4438_s13, %s4054_s17  ;;  %s4059_s8 = sshll.u32 %s4252_s15, 4  ;;  %s4060_s8 = int_to_ptr.vmem [resolvable:$false] %s4059_s8 }
  0x50   : > { %s4061_s26 = scalar_lea.vmem %s4060_s8, 36864  ;;  %p4062_p11 = scmp.lt.s32.totalorder %s4438_s13, %s4060_s8 }
  0x51   : > { %p4057_p7 = pnand %p4055_p3, %p4446_p8  ;;  %p4063_p2 = scmp.lt.s32.totalorder %s4061_s26, %s4054_s17 }
  0x53   : > { %p4058_p9 = pneg %p4057_p7  ;;  %p4064_p0 = por %p4063_p2, %p4062_p11 }
  0x55   : > { %p4065_p6 = pnand %p4064_p0, %p4058_p9 }
  0x57   : > { %4068 = shalt.err (!%p4065_p6)
}
  0x58   : > { %s4993_s25 = smov 384   ;;  %s4254_s27 = smov 192  }
  0x59   : > { %s4255_s12 = smov 12   ;;  %s5019_s15 = smul.u32 192, %s4243_s22 }
  0x5a   : > { %3552 = dma.hbm_to_vmem [thread:$0]  (!%p4373_p4), %s4435_s16, 18432, %s4438_s13, %s4440_s14, %s4993_s25, %s4254_s27, %s4255_s12  }
  0x5b   : > { %s5020_s3 = sld [smem:[#allocation22_spill]]  ;;  %s267_s0 = scalar_lea.vmem [#allocation8], %s4422_s7 }
  0x5c   : > { %s274_s2 = sshll.u32 %s267_s0, 4  ;;  %s4481_s2 = int_to_ptr.vmem [resolvable:$true] %s274_s2 }
  0x61   : > { %s4478_s26 = scalar_lea.hbm %s5020_s3, %s5019_s15  ;;  %s4074_s25 = scalar_lea.hbm %s5020_s3, 36864 }
  0x62   : > { %s4069_s11 = scalar_lea.hbm %s4478_s26, 18432  ;;  %p4075_p13 = scmp.lt.u32.totalorder %s4478_s26, %s5020_s3 }
  0x63   : > { %p4070_p2 = scmp.ne.s32.totalorder %s4478_s26, %s4069_s11  ;;  %p4076_p1 = scmp.lt.u32.totalorder %s4074_s25, %s4069_s11 }
  0x64   : > { %p4078_p5 = scmp.lt.u32.totalorder %s4069_s11, %s4478_s26 }
  0x65   : > { %p4072_p11 = pnand %p4070_p2, %p4446_p8  ;;  %p4077_p10 = por %p4076_p1, %p4075_p13 }
  0x67   : > { %p4073_p12 = pneg %p4072_p11  ;;  %p4079_p3 = por %p4078_p5, %p4077_p10 }
  0x69   : > { %p4080_p7 = pnand %p4079_p3, %p4073_p12 }
  0x6b   : > { %4083 = shalt.err (!%p4080_p7)
}
  0x6c   : > { %s4084_s0 = scalar_lea.vmem %s4481_s2, 18432  ;;  %s4256_s7 = smov [#allocation8]  }
  0x6d   : > { %p4085_p9 = scmp.ne.s32.totalorder %s4481_s2, %s4084_s0  ;;  %s4089_s8 = sshll.u32 %s4256_s7, 4  ;;  %s4090_s8 = int_to_ptr.vmem [resolvable:$false] %s4089_s8 }
  0x6e   : > { %s4091_s13 = scalar_lea.vmem %s4090_s8, 36864  ;;  %p4092_p2 = scmp.lt.s32.totalorder %s4481_s2, %s4090_s8 }
  0x6f   : > { %p4087_p0 = pnand %p4085_p9, %p4446_p8  ;;  %p4093_p11 = scmp.lt.s32.totalorder %s4091_s13, %s4084_s0 }
  0x71   : > { %p4088_p6 = pneg %p4087_p0  ;;  %p4094_p13 = por %p4093_p11, %p4092_p2 }
  0x73   : > { %p4095_p1 = pnand %p4094_p13, %p4088_p6 }
  0x75   : > { %4098 = shalt.err (!%p4095_p1)
}
  0x76   : > { %s5021_s11 = smov 384   ;;  %s4257_s25 = smov [#allocation5]  }
  0x77   : > { %3555 = dma.hbm_to_vmem [thread:$0]  (!%p4373_p4), %s4478_s26, 18432, %s4481_s2, %s4440_s14, %s5021_s11, %s4254_s27, %s4255_s12  }
  0x78   : > { %s228_s16 = sshll.u32 %s4257_s25, 4  ;;  %s5022_s17 = sand.u32 1, %s4235_s20   ;;  %s229_s16 = int_to_ptr.vmem [resolvable:$true] %s228_s16 }
  0x79   : > { %s3522_s15 = smul.u32 3, %s5022_s17  ;;  %s4099_s13 = scalar_lea.hbm %s4974_s1, 1536 }
  0x7a   : > { %s3362_s0 = smul.u32 48, %s4243_s22  ;;  %p4100_p12 = scmp.ne.s32.totalorder %s4974_s1, %s4099_s13 }
  0x7b   : > { %p5023_p10 = scmp.ne.s32.totalorder %s5010_s9, 0  ;;  %p4106_p9 = scmp.lt.u32.totalorder %s4099_s13, %s4974_s1 }
  0x7d   : > { %p5024_p5 = pneg %p5023_p10 }
  0x7f   : > { %p4102_p3 = pnand %p4100_p12, %p5024_p5 }
  0x81   : > { %p4103_p7 = pneg %p4102_p3 }
  0x83   : > { %p4108_p0 = pnand %p4106_p9, %p4103_p7 }
  0x85   : > { %4111 = shalt.err (!%p4108_p0)
}
  0x86   : > { %s4112_s27 = scalar_lea.vmem %s229_s16, 1536  ;;  %p5025_p2 = pmov %p5024_p5 }
  0x87   : > { %p4113_p6 = scmp.ne.s32.totalorder %s229_s16, %s4112_s27  ;;  %p4120_p1 = scmp.lt.s32.totalorder %s229_s16, %s229_s16 }
  0x88   : > { %p4121_p4 = scmp.lt.s32.totalorder %s4112_s27, %s4112_s27 }
  0x89   : > { %p4115_p11 = pnand %p4113_p6, %p5025_p2 }
  0x8a   : > { %p4122_p8 = por %p4121_p4, %p4120_p1 }
  0x8b   : > { %p4116_p13 = pneg %p4115_p11 }
  0x8d   : > { %p4123_p5 = pnand %p4122_p8, %p4116_p13 }
  0x8f   : > { %4126 = shalt.err (!%p4123_p5)
}
  0x90   : > { %s5026_s3 = smov 48   ;;  %s5027_s18 = smov 768  }
  0x91   : > { %3548 = dma.hbm_to_vmem [thread:$0]  (!%p5023_p10), %s4974_s1, 1536, %s229_s16, [#allocation6], %s5027_s18, %s5027_s18, %s5026_s3  }
  0x92   : > { %s4537_s25 = scalar_lea.hbm %s4977_s4, %s3362_s0  ;;  %s288_s17 = scalar_lea.vmem [#allocation9], %s3522_s15 }
  0x93   : > { %s296_s7 = sshll.u32 %s288_s17, 4  ;;  %s4127_s9 = scalar_lea.hbm %s4537_s25, 48  ;;  %s297_s7 = int_to_ptr.vmem [resolvable:$true] %s296_s7 }
  0x94   : > { %p4128_p4 = scmp.ne.s32.totalorder %s4537_s25, %s4127_s9  ;;  %p5028_p8 = scmp.ne.s32.totalorder %s5018_s30, 0 }
  0x95   : > { %s4132_s16 = scalar_lea.hbm %s4977_s4, 96  ;;  %p4133_p10 = scmp.lt.u32.totalorder %s4537_s25, %s4977_s4 }
  0x96   : > { %p4130_p12 = pnand %p4128_p4, %p5028_p8  ;;  %p4134_p7 = scmp.lt.u32.totalorder %s4132_s16, %s4127_s9 }
  0x97   : > { %p4136_p0 = scmp.lt.u32.totalorder %s4127_s9, %s4537_s25 }
  0x98   : > { %p4131_p3 = pneg %p4130_p12  ;;  %p4135_p9 = por %p4134_p7, %p4133_p10 }
  0x9a   : > { %p4137_p6 = por %p4136_p0, %p4135_p9 }
  0x9c   : > { %p4138_p2 = pnand %p4137_p6, %p4131_p3 }
  0x9e   : > { %4141 = shalt.err (!%p4138_p2)
}
  0x9f   : > { %s4142_s15 = scalar_lea.vmem %s297_s7, 48  ;;  %s4258_s0 = smov [#allocation9]  }
  0xa0   : > { %p4143_p11 = scmp.ne.s32.totalorder %s297_s7, %s4142_s15  ;;  %s4147_s3 = sshll.u32 %s4258_s0, 4  ;;  %s4148_s3 = int_to_ptr.vmem [resolvable:$false] %s4147_s3 }
  0xa1   : > { %s4149_s18 = scalar_lea.vmem %s4148_s3, 96  ;;  %p4150_p5 = scmp.lt.s32.totalorder %s297_s7, %s4148_s3 }
  0xa2   : > { %p4145_p13 = pnand %p4143_p11, %p5028_p8  ;;  %p4151_p4 = scmp.lt.s32.totalorder %s4149_s18, %s4142_s15 }
  0xa4   : > { %p4146_p1 = pneg %p4145_p13  ;;  %p4152_p12 = por %p4151_p4, %p4150_p5 }
  0xa6   : > { %p4153_p7 = pnand %p4152_p12, %p4146_p1 }
  0xa8   : > { %4156 = shalt.err (!%p4153_p7)
}
  0xa9   : > { %p5029_p10 = scmp.ne.s32.totalorder %s5011_s10, 0  ;;  %p5030_p3 = scmp.ne.s32.totalorder %s5009_s6, 0 }
  0xaa   : > { %p5031_p8 = scmp.eq.s32.totalorder (!%p5030_p3), %s4324_s24, 0 }
  0xab   : > { %3558 = dma.hbm_to_vmem [thread:$0]  (!%p5029_p10), %s4537_s25, 48, %s297_s7, %s4440_s14  }
  0xac   : > { %305 = sbr.rel (%p5030_p3) target bundleno = 748 (0x2ec), region = 40 }
  0xb3   : > { %4210 = dma.done.wait (%p5031_p8), [#allocation3], 1536   ;;  %p5032_p9 = pmov %p5031_p8 }
  0xb4   : > { %p5033_p0 = pmov %p5031_p8 }
  0xb5   : > { %4212 = vsyncadd (%p5032_p9), [#allocation3], 4294965760 }
  0xb6   : > { %4214 = dma.done.wait (%p5033_p0), [#allocation6], 1536   ;;  %p5034_p6 = pmov %p5033_p0 }
  0xb7   : > { %s315_s10 = sand.u32 1, %s4324_s24   ;;  %s4569_s14 = sand.u32 1, %s4231_s19  }
  0xb8   : > { %4216 = vsyncadd (%p5034_p6), [#allocation6], 4294965760  ;;  %s3523_s6 = smul.u32 1152, %s4569_s14  ;;  %s316_s30 = scalar_lea.sflag [#allocation3], %s315_s10 }
  0xb9   : > { %p5035_p2 = scmp.ne.s32.totalorder %s5005_s28, 0 }
  0xba   : > { %s4572_s23 = scalar_lea.vmem [#allocation7], %s3523_s6 }
  0xbb   : > { %4218 = dma.done.wait (%p5035_p2), %s316_s30, 36912  }
  0xbc   : > { %4220 = vsyncadd (%p5035_p2), %s316_s30, 4294930384  ;;  %s4578_s12 = scalar_lea.vmem [#allocation8], %s3523_s6  ;;  %v401_v48 = vld [vmem:[#allocation5 + $0x8] sm:$0xff]  ;;  %v407_v49 = vld [vmem:[#allocation5 + $0x38] sm:$0xff]  ;;  %s3524_s24 = smul.u32 3, %s4569_s14 }
  0xbd   : > { %v3627_v0 = vld [vmem:[%s4578_s12 + $0x4] ss:$12 sps:$4 sm:$0xff]   ;;  %v3631_v2 = vld [vmem:[%s4578_s12] ss:$12 sps:$4 sm:$0xff]   ;;  %v3633_v4 = vld [vmem:[%s4578_s12 + $0x1c] ss:$12 sps:$4 sm:$0xff]   ;;  %v4629_v53 = vpack.c.bf16 %v407_v49, %v401_v48 }
  0xbe   : > { %v3629_v1 = vld [vmem:[%s4578_s12 + $0x184] ss:$12 sps:$4 sm:$0xff]   ;;  %1570 = vmatprep.subr.bf16.mxu1 %v3627_v0  ;;  %v3632_v3 = vld [vmem:[%s4578_s12 + $0x180] ss:$12 sps:$4 sm:$0xff]   ;;  %v3635_v5 = vld [vmem:[%s4578_s12 + $0x19c] ss:$12 sps:$4 sm:$0xff]  }
  0xbf   : > { %1613 = vmatprep.subr.bf16.mxu0 %v3629_v1  ;;  %1571 = vmatpush1.bf16.msra.mxu1 %v3631_v2  ;;  %v3637_v6 = vld [vmem:[%s4578_s12 + $0x18] ss:$12 sps:$4 sm:$0xff]   ;;  %v3639_v8 = vld [vmem:[%s4578_s12 + $0x34] ss:$12 sps:$4 sm:$0xff]   ;;  %v3643_v10 = vld [vmem:[%s4578_s12 + $0x30] ss:$12 sps:$4 sm:$0xff]  }
  0xc0   : > { %1614 = vmatpush1.bf16.msra.mxu0 %v3632_v3  ;;  %1572 = vmatprep.subr.bf16.mxu1 %v3633_v4  ;;  %v3638_v7 = vld [vmem:[%s4578_s12 + $0x198] ss:$12 sps:$4 sm:$0xff]   ;;  %v3641_v9 = vld [vmem:[%s4578_s12 + $0x1b4] ss:$12 sps:$4 sm:$0xff]   ;;  %v3644_v11 = vld [vmem:[%s4578_s12 + $0x1b0] ss:$12 sps:$4 sm:$0xff]  }
  0xc1   : > { %1615 = vmatprep.subr.bf16.mxu0 %v3635_v5  ;;  %v3645_v12 = vld [vmem:[%s4578_s12 + $0x4c] ss:$12 sps:$4 sm:$0xff]   ;;  %v3649_v14 = vld [vmem:[%s4578_s12 + $0x48] ss:$12 sps:$4 sm:$0xff]   ;;  %v3651_v16 = vld [vmem:[%s4578_s12 + $0x64] ss:$12 sps:$4 sm:$0xff]   ;;  %1602 = vmatprep.mubr.bf16.mxu1 %v4629_v53 }
  0xc2   : > { %v3647_v13 = vld [vmem:[%s4578_s12 + $0x1cc] ss:$12 sps:$4 sm:$0xff]   ;;  %v3650_v15 = vld [vmem:[%s4578_s12 + $0x1c8] ss:$12 sps:$4 sm:$0xff]   ;;  %v3653_v17 = vld [vmem:[%s4578_s12 + $0x1e4] ss:$12 sps:$4 sm:$0xff]  }
  0xc3   : > { %1573 = vmatpush1.bf16.msra.mxu1 %v3637_v6  ;;  %v3655_v18 = vld [vmem:[%s4578_s12 + $0x60] ss:$12 sps:$4 sm:$0xff]   ;;  %v3657_v20 = vld [vmem:[%s4578_s12 + $0x7c] ss:$12 sps:$4 sm:$0xff]   ;;  %v3661_v22 = vld [vmem:[%s4578_s12 + $0x78] ss:$12 sps:$4 sm:$0xff]  }
  0xc4   : > { %1616 = vmatpush1.bf16.msra.mxu0 %v3638_v7  ;;  %1574 = vmatprep.subr.bf16.mxu1 %v3639_v8  ;;  %v3656_v19 = vld [vmem:[%s4578_s12 + $0x1e0] ss:$12 sps:$4 sm:$0xff]   ;;  %v3659_v21 = vld [vmem:[%s4578_s12 + $0x1fc] ss:$12 sps:$4 sm:$0xff]   ;;  %v3662_v23 = vld [vmem:[%s4578_s12 + $0x1f8] ss:$12 sps:$4 sm:$0xff]  }
  0xc5   : > { %1617 = vmatprep.subr.bf16.mxu0 %v3641_v9  ;;  %v3663_v24 = vld [vmem:[%s4578_s12 + $0x94] ss:$12 sps:$4 sm:$0xff]   ;;  %v3667_v26 = vld [vmem:[%s4578_s12 + $0x90] ss:$12 sps:$4 sm:$0xff]   ;;  %v3669_v28 = vld [vmem:[%s4578_s12 + $0xac] ss:$12 sps:$4 sm:$0xff]  }
  0xc6   : > { %v3665_v25 = vld [vmem:[%s4578_s12 + $0x214] ss:$12 sps:$4 sm:$0xff]   ;;  %v3668_v27 = vld [vmem:[%s4578_s12 + $0x210] ss:$12 sps:$4 sm:$0xff]   ;;  %v3671_v29 = vld [vmem:[%s4578_s12 + $0x22c] ss:$12 sps:$4 sm:$0xff]  }
  0xc7   : > { %1575 = vmatpush1.bf16.msra.mxu1 %v3643_v10  ;;  %v3673_v30 = vld [vmem:[%s4578_s12 + $0xa8] ss:$12 sps:$4 sm:$0xff]   ;;  %v3675_v32 = vld [vmem:[%s4578_s12 + $0xc4] ss:$12 sps:$4 sm:$0xff]   ;;  %v3679_v34 = vld [vmem:[%s4578_s12 + $0xc0] ss:$12 sps:$4 sm:$0xff]  }
  0xc8   : > { %1618 = vmatpush1.bf16.msra.mxu0 %v3644_v11  ;;  %1576 = vmatprep.subr.bf16.mxu1 %v3645_v12  ;;  %v3674_v31 = vld [vmem:[%s4578_s12 + $0x228] ss:$12 sps:$4 sm:$0xff]   ;;  %v3677_v33 = vld [vmem:[%s4578_s12 + $0x244] ss:$12 sps:$4 sm:$0xff]   ;;  %v3680_v35 = vld [vmem:[%s4578_s12 + $0x240] ss:$12 sps:$4 sm:$0xff]  }
  0xc9   : > { %1619 = vmatprep.subr.bf16.mxu0 %v3647_v13  ;;  %v3681_v36 = vld [vmem:[%s4578_s12 + $0xdc] ss:$12 sps:$4 sm:$0xff]   ;;  %v3685_v38 = vld [vmem:[%s4578_s12 + $0xd8] ss:$12 sps:$4 sm:$0xff]   ;;  %v3687_v40 = vld [vmem:[%s4578_s12 + $0xf4] ss:$12 sps:$4 sm:$0xff]  }
  0xca   : > { %v3683_v37 = vld [vmem:[%s4578_s12 + $0x25c] ss:$12 sps:$4 sm:$0xff]   ;;  %v3686_v39 = vld [vmem:[%s4578_s12 + $0x258] ss:$12 sps:$4 sm:$0xff]   ;;  %v3689_v41 = vld [vmem:[%s4578_s12 + $0x274] ss:$12 sps:$4 sm:$0xff]  }
  0xcb   : > { %1577 = vmatpush1.bf16.msra.mxu1 %v3649_v14  ;;  %v3691_v42 = vld [vmem:[%s4578_s12 + $0xf0] ss:$12 sps:$4 sm:$0xff]   ;;  %v3693_v44 = vld [vmem:[%s4578_s12 + $0x10c] ss:$12 sps:$4 sm:$0xff]   ;;  %v3697_v46 = vld [vmem:[%s4578_s12 + $0x108] ss:$12 sps:$4 sm:$0xff]  }
  0xcc   : > { %1620 = vmatpush1.bf16.msra.mxu0 %v3650_v15  ;;  %1578 = vmatprep.subr.bf16.mxu1 %v3651_v16  ;;  %v3692_v43 = vld [vmem:[%s4578_s12 + $0x270] ss:$12 sps:$4 sm:$0xff]   ;;  %v3695_v45 = vld [vmem:[%s4578_s12 + $0x28c] ss:$12 sps:$4 sm:$0xff]   ;;  %v3698_v47 = vld [vmem:[%s4578_s12 + $0x288] ss:$12 sps:$4 sm:$0xff]  }
  0xcd   : > { %1621 = vmatprep.subr.bf16.mxu0 %v3653_v17  ;;  %v403_v50 = vld [vmem:[#allocation5 + $0x18] sm:$0xff]  ;;  %v409_v51 = vld [vmem:[#allocation5 + $0x48] sm:$0xff]  ;;  %v3699_v52 = vld [vmem:[%s4578_s12 + $0x124] ss:$12 sps:$4 sm:$0xff]   ;;  %s337_s28 = scalar_lea.vmem [#allocation9], %s3524_s24  ;;  %s3525_s26 = smul.u32 24, %s4569_s14 }
  0xce   : > { %v4631_v54 = vpack.c.bf16 %v409_v51, %v403_v50  ;;  %v3701_v55 = vld [vmem:[%s4578_s12 + $0x2a4] ss:$12 sps:$4 sm:$0xff]   ;;  %v3703_v56 = vld [vmem:[%s4578_s12 + $0x120] ss:$12 sps:$4 sm:$0xff]   ;;  %v3705_v58 = vld [vmem:[%s4578_s12 + $0x13c] ss:$12 sps:$4 sm:$0xff]  }
  0xcf   : > { %1579 = vmatpush1.bf16.msra.mxu1 %v3655_v18  ;;  %v3704_v57 = vld [vmem:[%s4578_s12 + $0x2a0] ss:$12 sps:$4 sm:$0xff]   ;;  %v3707_v59 = vld [vmem:[%s4578_s12 + $0x2bc] ss:$12 sps:$4 sm:$0xff]   ;;  %v3709_v60 = vld [vmem:[%s4578_s12 + $0x138] ss:$12 sps:$4 sm:$0xff]  }
  0xd0   : > { %1622 = vmatpush1.bf16.msra.mxu0 %v3656_v19  ;;  %1580 = vmatprep.subr.bf16.mxu1 %v3657_v20  ;;  %v3710_v61 = vld [vmem:[%s4578_s12 + $0x2b8] ss:$12 sps:$4 sm:$0xff]   ;;  %v3711_v62 = vld [vmem:[%s4578_s12 + $0x154] ss:$12 sps:$4 sm:$0xff]   ;;  %v3715_v0 = vld [vmem:[%s4578_s12 + $0x150] ss:$12 sps:$4 sm:$0xff]  }
  0xd1   : > { %1623 = vmatprep.subr.bf16.mxu0 %v3659_v21  ;;  %1645 = vmatprep.mubr.bf16.mxu0 %v4631_v54  ;;  %v3713_v63 = vld [vmem:[%s4578_s12 + $0x2d4] ss:$12 sps:$4 sm:$0xff]   ;;  %v3716_v1 = vld [vmem:[%s4578_s12 + $0x2d0] ss:$12 sps:$4 sm:$0xff]   ;;  %v3717_v2 = vld [vmem:[%s4578_s12 + $0x16c] ss:$12 sps:$4 sm:$0xff]  }
  0xd2   : > { %v3719_v3 = vld [vmem:[%s4578_s12 + $0x2ec] ss:$12 sps:$4 sm:$0xff]   ;;  %v3721_v4 = vld [vmem:[%s4578_s12 + $0x168] ss:$12 sps:$4 sm:$0xff]   ;;  %v400_v6 = vld [vmem:[#allocation5] sm:$0xff]  ;;  %s373_s11 = scalar_lea.vmem [#allocation10], %s3525_s26 }
  0xd3   : > { %1581 = vmatpush1.bf16.msra.mxu1 %v3661_v22  ;;  %v3722_v5 = vld [vmem:[%s4578_s12 + $0x2e8] ss:$12 sps:$4 sm:$0xff]   ;;  %v3725_v7 = vld [vmem:[%s4578_s12 + $0x304] ss:$12 sps:$4 sm:$0xff]   ;;  %v3723_v12 = vld [vmem:[%s4578_s12 + $0x300] ss:$12 sps:$4 sm:$0xff]  }
  0xd4   : > { %1624 = vmatpush1.bf16.msra.mxu0 %v3662_v23  ;;  %1582 = vmatprep.subr.bf16.mxu1 %v3663_v24  ;;  %v406_v8 = vld [vmem:[#allocation5 + $0x30] sm:$0xff]  ;;  %v408_v10 = vld [vmem:[#allocation5 + $0x40] sm:$0xff]  ;;  %v3730_v16 = vld [vmem:[%s4578_s12 + $0x31c] ss:$12 sps:$4 sm:$0xff]   ;;  %s2906_s25 = sshll.u32 %s373_s11, 4  ;;  %s3367_s17 = smul.u32 192, %s4239_s21  ;;  %s4919_s25 = int_to_ptr.vmem [resolvable:$true] %s2906_s25 }
  0xd5   : > { %1625 = vmatprep.subr.bf16.mxu0 %v3665_v25  ;;  %v402_v9 = vld [vmem:[#allocation5 + $0x10] sm:$0xff]  ;;  %v4653_v13 = vpack.c.bf16 %v406_v8, %v400_v6  ;;  %v3731_v17 = vld [vmem:[%s4578_s12 + $0xe0] ss:$12 sps:$4 sm:$0xff]   ;;  %v3728_v18 = vld [vmem:[%s4578_s12 + $0x318] ss:$12 sps:$4 sm:$0xff]   ;;  %s2890_s21 = scalar_lea.sflag [#allocation4], %s4569_s14 }
  0xd6   : > { %v3726_v11 = vld [vmem:[%s4578_s12 + $0xc8] ss:$12 sps:$4 sm:$0xff]   ;;  %v4655_v14 = vpack.c.bf16 %v408_v10, %v402_v9  ;;  %v3732_v19 = vld [vmem:[%s4578_s12 + $0x20] ss:$12 sps:$4 sm:$0xff]   ;;  %v3736_v21 = vld [vmem:[%s4578_s12 + $0xf8] ss:$12 sps:$4 sm:$0xff]   ;;  %s4924_s8 = scalar_lea.hbm %s4978_s5, %s3367_s17 }
  0xd7   : > { %1583 = vmatpush1.bf16.msra.mxu1 %v3667_v26  ;;  %v3727_v15 = vld [vmem:[%s4578_s12 + $0x8] ss:$12 sps:$4 sm:$0xff]   ;;  %v3733_v22 = vld [vmem:[%s4578_s12 + $0x330] ss:$12 sps:$4 sm:$0xff]   ;;  %v3737_v23 = vld [vmem:[%s4578_s12 + $0x38] ss:$12 sps:$4 sm:$0xff]  }
  0xd8   : > { %1626 = vmatpush1.bf16.msra.mxu0 %v3668_v27  ;;  %1584 = vmatprep.subr.bf16.mxu1 %v3669_v28  ;;  %v3735_v20 = vld [vmem:[%s4578_s12 + $0x334] ss:$12 sps:$4 sm:$0xff]   ;;  %v3740_v24 = vld [vmem:[%s4578_s12 + $0x34c] ss:$12 sps:$4 sm:$0xff]   ;;  %v3741_v25 = vld [vmem:[%s4578_s12 + $0x110] ss:$12 sps:$4 sm:$0xff]  }
  0xd9   : > { %1627 = vmatprep.subr.bf16.mxu0 %v3671_v29  ;;  %v3738_v26 = vld [vmem:[%s4578_s12 + $0x348] ss:$12 sps:$4 sm:$0xff]   ;;  %v3742_v27 = vld [vmem:[%s4578_s12 + $0x50] ss:$12 sps:$4 sm:$0xff]   ;;  %v3771_v49 = vld [vmem:[%s4578_s12 + $0x260] ss:$12 sps:$4 sm:$0xff]  }
  0xda   : > { %v3745_v28 = vld [vmem:[%s4578_s12 + $0x364] ss:$12 sps:$4 sm:$0xff]   ;;  %v3746_v29 = vld [vmem:[%s4578_s12 + $0x128] ss:$12 sps:$4 sm:$0xff]   ;;  %v3792_v6 = vld [vmem:[%s4578_s12 + $0x200] ss:$12 sps:$4 sm:$0xff]  }
  0xdb   : > { %1585 = vmatpush1.bf16.msra.mxu1 %v3673_v30  ;;  %v3743_v30 = vld [vmem:[%s4578_s12 + $0x360] ss:$12 sps:$4 sm:$0xff]   ;;  %v3770_v48 = vld [vmem:[%s4578_s12 + $0x3dc] ss:$12 sps:$4 sm:$0xff]   ;;  %v3768_v50 = vld [vmem:[%s4578_s12 + $0x3d8] ss:$12 sps:$4 sm:$0xff]  }
  0xdc   : > { %1628 = vmatpush1.bf16.msra.mxu0 %v3674_v31  ;;  %1586 = vmatprep.subr.bf16.mxu1 %v3675_v32  ;;  %v3747_v31 = vld [vmem:[%s4578_s12 + $0x68] ss:$12 sps:$4 sm:$0xff]   ;;  %v3796_v8 = vld [vmem:[%s4578_s12 + $0x2d8] ss:$12 sps:$4 sm:$0xff]   ;;  %v3793_v9 = vld [vmem:[%s4578_s12 + $0x450] ss:$12 sps:$4 sm:$0xff]  }
  0xdd   : > { %1629 = vmatprep.subr.bf16.mxu0 %v3677_v33  ;;  %v3750_v32 = vld [vmem:[%s4578_s12 + $0x37c] ss:$12 sps:$4 sm:$0xff]   ;;  %v3751_v33 = vld [vmem:[%s4578_s12 + $0x140] ss:$12 sps:$4 sm:$0xff]   ;;  %v3797_v10 = vld [vmem:[%s4578_s12 + $0x218] ss:$12 sps:$4 sm:$0xff]  }
  0xde   : > { %v405_v51 = vld [vmem:[#allocation5 + $0x28] sm:$0xff]  ;;  %s4157_s13 = scalar_lea.vmem %s4919_s25, 384  ;;  %p5036_p13 = scmp.ne.s32.totalorder %s5006_s29, 0 }
  0xdf   : > { %1587 = vmatpush1.bf16.msra.mxu1 %v3679_v34  ;;  %v3748_v34 = vld [vmem:[%s4578_s12 + $0x378] ss:$12 sps:$4 sm:$0xff]   ;;  %p4158_p11 = scmp.ne.s32.totalorder %s4919_s25, %s4157_s13  ;;  %s4259_s16 = smov [#allocation10]  }
  0xe0   : > { %1630 = vmatpush1.bf16.msra.mxu0 %v3680_v35  ;;  %1588 = vmatprep.subr.bf16.mxu1 %v3681_v36  ;;  %v3752_v35 = vld [vmem:[%s4578_s12 + $0x80] ss:$12 sps:$4 sm:$0xff]   ;;  %s4161_s2 = sshll.u32 %s4259_s16, 4  ;;  %s4162_s2 = int_to_ptr.vmem [resolvable:$false] %s4161_s2 }
  0xe1   : > { %1631 = vmatprep.subr.bf16.mxu0 %v3683_v37  ;;  %v3755_v36 = vld [vmem:[%s4578_s12 + $0x394] ss:$12 sps:$4 sm:$0xff]   ;;  %v3756_v37 = vld [vmem:[%s4578_s12 + $0x158] ss:$12 sps:$4 sm:$0xff]   ;;  %p4159_p1 = pnand %p4158_p11, %p5036_p13  ;;  %s4163_s27 = scalar_lea.vmem %s4162_s2, 768 }
  0xe2   : > { %p4164_p4 = scmp.lt.s32.totalorder %s4919_s25, %s4162_s2  ;;  %p4165_p12 = scmp.lt.s32.totalorder %s4163_s27, %s4157_s13 }
  0xe3   : > { %1589 = vmatpush1.bf16.msra.mxu1 %v3685_v38  ;;  %v3753_v38 = vld [vmem:[%s4578_s12 + $0x390] ss:$12 sps:$4 sm:$0xff]   ;;  %p4160_p5 = pneg %p4159_p1 }
  0xe4   : > { %1632 = vmatpush1.bf16.msra.mxu0 %v3686_v39  ;;  %1590 = vmatprep.subr.bf16.mxu1 %v3687_v40  ;;  %v3757_v39 = vld [vmem:[%s4578_s12 + $0x98] ss:$12 sps:$4 sm:$0xff]   ;;  %p4166_p7 = por %p4165_p12, %p4164_p4 }
  0xe5   : > { %1633 = vmatprep.subr.bf16.mxu0 %v3689_v41  ;;  %v3760_v40 = vld [vmem:[%s4578_s12 + $0x3ac] ss:$12 sps:$4 sm:$0xff]   ;;  %v3761_v41 = vld [vmem:[%s4578_s12 + $0x170] ss:$12 sps:$4 sm:$0xff]  }
  0xe6   : > { %p4167_p10 = pnand %p4166_p7, %p4160_p5 }
  0xe7   : > { %1591 = vmatpush1.bf16.msra.mxu1 %v3691_v42  ;;  %v3758_v42 = vld [vmem:[%s4578_s12 + $0x3a8] ss:$12 sps:$4 sm:$0xff]  }
  0xe8   : > { %1634 = vmatpush1.bf16.msra.mxu0 %v3692_v43  ;;  %1592 = vmatprep.subr.bf16.mxu1 %v3693_v44  ;;  %v3762_v43 = vld [vmem:[%s4578_s12 + $0xb0] ss:$12 sps:$4 sm:$0xff]  }
  0xe9   : > { %1635 = vmatprep.subr.bf16.mxu0 %v3695_v45  ;;  %v3765_v44 = vld [vmem:[%s4578_s12 + $0x3c4] ss:$12 sps:$4 sm:$0xff]   ;;  %v3766_v45 = vld [vmem:[%s4578_s12 + $0x248] ss:$12 sps:$4 sm:$0xff]  }
  0xeb   : > { %1593 = vmatpush1.bf16.msra.mxu1 %v3697_v46  ;;  %v3763_v46 = vld [vmem:[%s4578_s12 + $0x3c0] ss:$12 sps:$4 sm:$0xff]  }
  0xec   : > { %1636 = vmatpush1.bf16.msra.mxu0 %v3698_v47  ;;  %1594 = vmatprep.subr.bf16.mxu1 %v3699_v52  ;;  %v3767_v47 = vld [vmem:[%s4578_s12 + $0x188] ss:$12 sps:$4 sm:$0xff]   ;;  %v411_v52 = vld [vmem:[#allocation5 + $0x58] sm:$0xff] }
  0xed   : > { %1637 = vmatprep.subr.bf16.mxu0 %v3701_v55  ;;  %v4698_v55 = vpack.c.bf16 %v411_v52, %v405_v51  ;;  %v3839_v51 = vld [vmem:[%s4572_s23 + $0xa8] ss:$12 sps:$4 sm:$0xff]   ;;  %v3842_v52 = vld [vmem:[%s4578_s12 + $0x3b0] ss:$12 sps:$4 sm:$0xff]  }
  0xef   : > { %1595 = vmatpush1.bf16.msra.mxu1 %v3703_v56  ;;  %v3775_v56 = vld [vmem:[%s4578_s12 + $0x3f4] ss:$12 sps:$4 sm:$0xff]  }
  0xf0   : > { %1638 = vmatpush1.bf16.msra.mxu0 %v3704_v57  ;;  %1596 = vmatprep.subr.bf16.mxu1 %v3705_v58  ;;  %v3776_v57 = vld [vmem:[%s4578_s12 + $0x278] ss:$12 sps:$4 sm:$0xff]   ;;  %v3773_v58 = vld [vmem:[%s4578_s12 + $0x3f0] ss:$12 sps:$4 sm:$0xff]  }
  0xf1   : > { %1639 = vmatprep.subr.bf16.mxu0 %v3707_v59  ;;  %v3777_v59 = vld [vmem:[%s4578_s12 + $0x1b8] ss:$12 sps:$4 sm:$0xff]  }
  0xf3   : > { %1597 = vmatpush1.bf16.msra.mxu1 %v3709_v60  ;;  %v3780_v60 = vld [vmem:[%s4578_s12 + $0x40c] ss:$12 sps:$4 sm:$0xff]  }
  0xf4   : > { %1640 = vmatpush1.bf16.msra.mxu0 %v3710_v61  ;;  %1598 = vmatprep.subr.bf16.mxu1 %v3711_v62  ;;  %v3781_v61 = vld [vmem:[%s4578_s12 + $0x290] ss:$12 sps:$4 sm:$0xff]   ;;  %v3778_v62 = vld [vmem:[%s4578_s12 + $0x408] ss:$12 sps:$4 sm:$0xff]  }
  0xf5   : > { %1641 = vmatprep.subr.bf16.mxu0 %v3713_v63  ;;  %v3782_v63 = vld [vmem:[%s4578_s12 + $0x1d0] ss:$12 sps:$4 sm:$0xff]  }
  0xf7   : > { %1599 = vmatpush1.bf16.msra.mxu1 %v3715_v0  ;;  %v3786_v0 = vld [vmem:[%s4578_s12 + $0x2a8] ss:$12 sps:$4 sm:$0xff]  }
  0xf8   : > { %1642 = vmatpush1.bf16.msra.mxu0 %v3716_v1  ;;  %1600 = vmatprep.subr.bf16.mxu1 %v3717_v2  ;;  %v3783_v1 = vld [vmem:[%s4578_s12 + $0x420] ss:$12 sps:$4 sm:$0xff]   ;;  %v3787_v2 = vld [vmem:[%s4578_s12 + $0x1e8] ss:$12 sps:$4 sm:$0xff]  }
  0xf9   : > { %1643 = vmatprep.subr.bf16.mxu0 %v3719_v3  ;;  %v3790_v3 = vld [vmem:[%s4578_s12 + $0x43c] ss:$12 sps:$4 sm:$0xff]  }
  0xfb   : > { %1601 = vmatpush1.bf16.msra.mxu1 %v3721_v4  ;;  %v3791_v4 = vld [vmem:[%s4578_s12 + $0x2c0] ss:$12 sps:$4 sm:$0xff]  }
  0xfc   : > { %1644 = vmatpush1.bf16.msra.mxu0 %v3722_v5  ;;  %3368 = vmatprep.subr.bf16.mxu1 %v3726_v11  ;;  %v3788_v5 = vld [vmem:[%s4578_s12 + $0x438] ss:$12 sps:$4 sm:$0xff]  }
  0xfd   : > { %1656 = vmatprep.subr.bf16.mxu0 %v3725_v7  ;;  %v3795_v7 = vld [vmem:[%s4578_s12 + $0x454] ss:$12 sps:$4 sm:$0xff]   ;;  %v3800_v11 = vld [vmem:[%s4578_s12 + $0x46c] ss:$12 sps:$4 sm:$0xff]  }
  0xfe   : > { %1603 = vmatmul.mubr.bf16.vlgmr.msra.gmra.mrb[0].mxu1 %v4653_v13 }
  0xff   : > { %1646 = vmatmul.mubr.bf16.vlgmr.msra.gmra.mrb[0].mxu0 %v4655_v14  ;;  %3369 = vmatpush3.bf16.msra.mxu1 %v3727_v15  ;;  %v3802_v15 = vld [vmem:[%s4578_s12 + $0x230] ss:$12 sps:$4 sm:$0xff]  }
 0x100   : > { %1657 = vmatpush1.bf16.msra.mxu0 %v3723_v12  ;;  %3370 = vmatprep.subr.bf16.mxu1 %v3731_v17  ;;  %v3801_v12 = vld [vmem:[%s4578_s12 + $0x2f0] ss:$12 sps:$4 sm:$0xff]  }
 0x101   : > { %1658 = vmatprep.subr.bf16.mxu0 %v3730_v16  ;;  %1731 = vmatprep.mubr.bf16.mxu1 %v4629_v53  ;;  %v3772_v53 = vld [vmem:[%s4578_s12 + $0x1a0] ss:$12 sps:$4 sm:$0xff]   ;;  %v410_v17 = vld [vmem:[#allocation5 + $0x50] sm:$0xff] }
 0x102   : > { %1688 = vmatprep.mubr.bf16.mxu0 %v4698_v55  ;;  %v404_v16 = vld [vmem:[#allocation5 + $0x20] sm:$0xff] }
 0x103   : > { %3371 = vmatpush3.bf16.msra.mxu1 %v3732_v19  ;;  %v3806_v19 = vld [vmem:[%s4572_s23 + $0x4] ss:$12 sps:$4 sm:$0xff]  }
 0x104   : > { %1659 = vmatpush1.bf16.msra.mxu0 %v3728_v18  ;;  %3372 = vmatprep.subr.bf16.mxu1 %v3736_v21  ;;  %v3803_v18 = vld [vmem:[%s4578_s12 + $0x3c8] ss:$12 sps:$4 sm:$0xff]   ;;  %v4729_v21 = vpack.c.bf16 %v410_v17, %v404_v16  ;;  %v3873_v16 = vld [vmem:[%s4572_s23 + $0x150] ss:$12 sps:$4 sm:$0xff]   ;;  %v3877_v17 = vld [vmem:[%s4572_s23 + $0x98] ss:$12 sps:$4 sm:$0xff]  }
 0x105   : > { %1660 = vmatprep.subr.bf16.mxu0 %v3735_v20  ;;  %v3804_v20 = vld [vmem:[%s4572_s23] ss:$12 sps:$4 sm:$0xff]  }
 0x107   : > { %3373 = vmatpush3.bf16.msra.mxu1 %v3737_v23  ;;  %v3808_v23 = vld [vmem:[%s4578_s12 + $0x3e0] ss:$12 sps:$4 sm:$0xff]  }
 0x108   : > { %1661 = vmatpush1.bf16.msra.mxu0 %v3733_v22  ;;  %3374 = vmatprep.subr.bf16.mxu1 %v3741_v25  ;;  %v3807_v22 = vld [vmem:[%s4578_s12 + $0x308] ss:$12 sps:$4 sm:$0xff]   ;;  %v3809_v25 = vld [vmem:[%s4572_s23 + $0x18] ss:$12 sps:$4 sm:$0xff]  }
 0x109   : > { %1662 = vmatprep.subr.bf16.mxu0 %v3740_v24  ;;  %v3811_v24 = vld [vmem:[%s4572_s23 + $0x1c] ss:$12 sps:$4 sm:$0xff]  }
 0x10b   : > { %3375 = vmatpush3.bf16.msra.mxu1 %v3742_v27  ;;  %v3813_v27 = vld [vmem:[%s4578_s12 + $0x3f8] ss:$12 sps:$4 sm:$0xff]  }
 0x10c   : > { %1663 = vmatpush1.bf16.msra.mxu0 %v3738_v26  ;;  %3376 = vmatprep.subr.bf16.mxu1 %v3746_v29  ;;  %v3812_v26 = vld [vmem:[%s4578_s12 + $0x320] ss:$12 sps:$4 sm:$0xff]   ;;  %v3814_v29 = vld [vmem:[%s4572_s23 + $0x30] ss:$12 sps:$4 sm:$0xff]  }
 0x10d   : > { %1664 = vmatprep.subr.bf16.mxu0 %v3745_v28  ;;  %v3816_v28 = vld [vmem:[%s4572_s23 + $0x34] ss:$12 sps:$4 sm:$0xff]  }
 0x10f   : > { %3377 = vmatpush3.bf16.msra.mxu1 %v3747_v31  ;;  %v3821_v31 = vld [vmem:[%s4572_s23 + $0x4c] ss:$12 sps:$4 sm:$0xff]  }
 0x110   : > { %1665 = vmatpush1.bf16.msra.mxu0 %v3743_v30  ;;  %3378 = vmatprep.subr.bf16.mxu1 %v3751_v33  ;;  %v3817_v30 = vld [vmem:[%s4578_s12 + $0x338] ss:$12 sps:$4 sm:$0xff]   ;;  %v3822_v33 = vld [vmem:[%s4578_s12 + $0x350] ss:$12 sps:$4 sm:$0xff]  }
 0x111   : > { %1666 = vmatprep.subr.bf16.mxu0 %v3750_v32  ;;  %v3819_v32 = vld [vmem:[%s4572_s23 + $0x48] ss:$12 sps:$4 sm:$0xff]  }
 0x113   : > { %3379 = vmatpush3.bf16.msra.mxu1 %v3752_v35  ;;  %v3826_v35 = vld [vmem:[%s4572_s23 + $0x64] ss:$12 sps:$4 sm:$0xff]  }
 0x114   : > { %1667 = vmatpush1.bf16.msra.mxu0 %v3748_v34  ;;  %3380 = vmatprep.subr.bf16.mxu1 %v3756_v37  ;;  %v3823_v34 = vld [vmem:[%s4578_s12 + $0x428] ss:$12 sps:$4 sm:$0xff]  }
 0x115   : > { %1668 = vmatprep.subr.bf16.mxu0 %v3755_v36  ;;  %v3824_v36 = vld [vmem:[%s4572_s23 + $0x60] ss:$12 sps:$4 sm:$0xff]   ;;  %v3827_v37 = vld [vmem:[%s4578_s12 + $0x368] ss:$12 sps:$4 sm:$0xff]  }
 0x117   : > { %3381 = vmatpush3.bf16.msra.mxu1 %v3757_v39  ;;  %v3831_v39 = vld [vmem:[%s4572_s23 + $0x7c] ss:$12 sps:$4 sm:$0xff]  }
 0x118   : > { %1669 = vmatpush1.bf16.msra.mxu0 %v3753_v38  ;;  %3382 = vmatprep.subr.bf16.mxu1 %v3761_v41  ;;  %v3828_v38 = vld [vmem:[%s4578_s12 + $0x440] ss:$12 sps:$4 sm:$0xff]  }
 0x119   : > { %1670 = vmatprep.subr.bf16.mxu0 %v3760_v40  ;;  %v3829_v40 = vld [vmem:[%s4572_s23 + $0x78] ss:$12 sps:$4 sm:$0xff]   ;;  %v3832_v41 = vld [vmem:[%s4578_s12 + $0x380] ss:$12 sps:$4 sm:$0xff]  }
 0x11b   : > { %3383 = vmatpush3.bf16.msra.mxu1 %v3762_v43  ;;  %v3836_v43 = vld [vmem:[%s4572_s23 + $0x94] ss:$12 sps:$4 sm:$0xff]  }
 0x11c   : > { %1671 = vmatpush1.bf16.msra.mxu0 %v3758_v42  ;;  %3390 = vmatprep.subr.bf16.mxu1 %v3766_v45  ;;  %v3833_v42 = vld [vmem:[%s4578_s12 + $0x458] ss:$12 sps:$4 sm:$0xff]  }
 0x11d   : > { %1672 = vmatprep.subr.bf16.mxu0 %v3765_v44  ;;  %v3834_v44 = vld [vmem:[%s4572_s23 + $0x90] ss:$12 sps:$4 sm:$0xff]   ;;  %v3837_v45 = vld [vmem:[%s4578_s12 + $0x398] ss:$12 sps:$4 sm:$0xff]  }
 0x11e   : > { %1732 = vmatmul.mubr.bf16.vlgmr.msra.gmra.mrb[4].mxu1 %v4653_v13  ;;  %v3798_v13 = vld [vmem:[%s4578_s12 + $0x468] ss:$12 sps:$4 sm:$0xff]  }
 0x11f   : > { %3391 = vmatpush3.bf16.msra.mxu1 %v3767_v47  ;;  %1772 = vmatprep.mubr.bf16.mxu1 %v4631_v54  ;;  %v3785_v54 = vld [vmem:[%s4578_s12 + $0x424] ss:$12 sps:$4 sm:$0xff]   ;;  %v3841_v47 = vld [vmem:[%s4572_s23 + $0xac] ss:$12 sps:$4 sm:$0xff]  }
 0x120   : > { %1673 = vmatpush1.bf16.msra.mxu0 %v3763_v46  ;;  %3392 = vmatprep.subr.bf16.mxu1 %v3771_v49  ;;  %v3838_v46 = vld [vmem:[%s4578_s12 + $0x470] ss:$12 sps:$4 sm:$0xff]  }
 0x121   : > { %1674 = vmatprep.subr.bf16.mxu0 %v3770_v48  ;;  %v383_v48 = vld [vmem:[#allocation2 + $0x8] sm:$0xff]  ;;  %v389_v49 = vld [vmem:[#allocation2 + $0x38] sm:$0xff] }
 0x123   : > { %3393 = vmatpush3.bf16.msra.mxu1 %v3772_v53  ;;  %v3845_v53 = vld [vmem:[%s4572_s23 + $0xc4] ss:$12 sps:$4 sm:$0xff]  }
 0x124   : > { %1675 = vmatpush1.bf16.msra.mxu0 %v3768_v50  ;;  %3394 = vmatprep.subr.bf16.mxu1 %v3776_v57  ;;  %v395_v50 = vpack.c.bf16 %v389_v49, %v383_v48  ;;  %v3847_v57 = vld [vmem:[%s4572_s23 + $0x8] ss:$12 sps:$4 sm:$0xff]   ;;  %v3911_v48 = vld [vmem:[%s4572_s23 + $0x2c0] ss:$12 sps:$4 sm:$0xff]   ;;  %v3908_v49 = vld [vmem:[%s4572_s23 + $0x1f8] ss:$12 sps:$4 sm:$0xff]  }
 0x125   : > { %1676 = vmatprep.subr.bf16.mxu0 %v3775_v56  ;;  %v3843_v56 = vld [vmem:[%s4572_s23 + $0xc0] ss:$12 sps:$4 sm:$0xff]  }
 0x127   : > { %3395 = vmatpush3.bf16.msra.mxu1 %v3777_v59  ;;  %v3851_v59 = vld [vmem:[%s4572_s23 + $0xe0] ss:$12 sps:$4 sm:$0xff]  }
 0x128   : > { %1677 = vmatpush1.bf16.msra.mxu0 %v3773_v58  ;;  %3396 = vmatprep.subr.bf16.mxu1 %v3781_v61  ;;  %v3850_v58 = vld [vmem:[%s4572_s23 + $0xdc] ss:$12 sps:$4 sm:$0xff]   ;;  %v3852_v61 = vld [vmem:[%s4572_s23 + $0x20] ss:$12 sps:$4 sm:$0xff]  }
 0x129   : > { %1678 = vmatprep.subr.bf16.mxu0 %v3780_v60  ;;  %v3848_v60 = vld [vmem:[%s4572_s23 + $0xd8] ss:$12 sps:$4 sm:$0xff]  }
 0x12b   : > { %3397 = vmatpush3.bf16.msra.mxu1 %v3782_v63  ;;  %v3856_v63 = vld [vmem:[%s4572_s23 + $0xf8] ss:$12 sps:$4 sm:$0xff]  }
 0x12c   : > { %1679 = vmatpush1.bf16.msra.mxu0 %v3778_v62  ;;  %3398 = vmatprep.subr.bf16.mxu1 %v3786_v0  ;;  %v3855_v62 = vld [vmem:[%s4572_s23 + $0xf4] ss:$12 sps:$4 sm:$0xff]   ;;  %v3857_v0 = vld [vmem:[%s4572_s23 + $0x38] ss:$12 sps:$4 sm:$0xff]  }
 0x12d   : > { %1680 = vmatprep.subr.bf16.mxu0 %v3785_v54  ;;  %v3853_v54 = vld [vmem:[%s4572_s23 + $0xf0] ss:$12 sps:$4 sm:$0xff]  }
 0x12f   : > { %3399 = vmatpush3.bf16.msra.mxu1 %v3787_v2  ;;  %v3861_v2 = vld [vmem:[%s4572_s23 + $0x110] ss:$12 sps:$4 sm:$0xff]  }
 0x130   : > { %1681 = vmatpush1.bf16.msra.mxu0 %v3783_v1  ;;  %3400 = vmatprep.subr.bf16.mxu1 %v3791_v4  ;;  %v3860_v1 = vld [vmem:[%s4572_s23 + $0x10c] ss:$12 sps:$4 sm:$0xff]   ;;  %v3862_v4 = vld [vmem:[%s4572_s23 + $0x50] ss:$12 sps:$4 sm:$0xff]  }
 0x131   : > { %1682 = vmatprep.subr.bf16.mxu0 %v3790_v3  ;;  %v3858_v3 = vld [vmem:[%s4572_s23 + $0x108] ss:$12 sps:$4 sm:$0xff]  }
 0x133   : > { %3401 = vmatpush3.bf16.msra.mxu1 %v3792_v6  ;;  %v3866_v6 = vld [vmem:[%s4572_s23 + $0x128] ss:$12 sps:$4 sm:$0xff]  }
 0x134   : > { %1683 = vmatpush1.bf16.msra.mxu0 %v3788_v5  ;;  %3402 = vmatprep.subr.bf16.mxu1 %v3796_v8  ;;  %v3865_v5 = vld [vmem:[%s4572_s23 + $0x124] ss:$12 sps:$4 sm:$0xff]   ;;  %v3867_v8 = vld [vmem:[%s4572_s23 + $0x68] ss:$12 sps:$4 sm:$0xff]  }
 0x135   : > { %1684 = vmatprep.subr.bf16.mxu0 %v3795_v7  ;;  %v3863_v7 = vld [vmem:[%s4572_s23 + $0x120] ss:$12 sps:$4 sm:$0xff]  }
 0x137   : > { %3403 = vmatpush3.bf16.msra.mxu1 %v3797_v10  ;;  %v3871_v10 = vld [vmem:[%s4572_s23 + $0x140] ss:$12 sps:$4 sm:$0xff]  }
 0x138   : > { %1685 = vmatpush1.bf16.msra.mxu0 %v3793_v9  ;;  %3404 = vmatprep.subr.bf16.mxu1 %v3801_v12  ;;  %v3870_v9 = vld [vmem:[%s4572_s23 + $0x13c] ss:$12 sps:$4 sm:$0xff]   ;;  %v3872_v12 = vld [vmem:[%s4572_s23 + $0x80] ss:$12 sps:$4 sm:$0xff]  }
 0x139   : > { %1686 = vmatprep.subr.bf16.mxu0 %v3800_v11  ;;  %v3868_v11 = vld [vmem:[%s4572_s23 + $0x138] ss:$12 sps:$4 sm:$0xff]  }
 0x13b   : > { %3405 = vmatpush3.bf16.msra.mxu1 %v3802_v15  ;;  %v3876_v15 = vld [vmem:[%s4572_s23 + $0x158] ss:$12 sps:$4 sm:$0xff]  }
 0x13c   : > { %1687 = vmatpush1.bf16.msra.mxu0 %v3798_v13  ;;  %3412 = vmatprep.subr.bf16.mxu1 %v3803_v18  ;;  %v3875_v13 = vld [vmem:[%s4572_s23 + $0x154] ss:$12 sps:$4 sm:$0xff]   ;;  %v3880_v18 = vld [vmem:[%s4572_s23 + $0x16c] ss:$12 sps:$4 sm:$0xff]  }
 0x13d   : > { %2590 = vmatprep.subr.bf16.mxu0 %v3806_v19  ;;  %v3881_v19 = vld [vmem:[%s4572_s23 + $0x170] ss:$12 sps:$4 sm:$0xff]  }
 0x13e   : > { %1773 = vmatmul.mubr.bf16.vlgmr.msra.gmra.mrb[8].mxu1 %v4655_v14  ;;  %v3818_v14 = vld [vmem:[%s4578_s12 + $0x410] ss:$12 sps:$4 sm:$0xff]  }
 0x13f   : > { %1689 = vmatmul.mubr.bf16.vlgmr.msra.gmra.mrb[0].mxu0 %v4729_v21  ;;  %3413 = vmatpush3.bf16.msra.mxu1 %v3807_v22  ;;  %v3885_v22 = vld [vmem:[%s4572_s23 + $0x184] ss:$12 sps:$4 sm:$0xff]  }
 0x140   : > { %2591 = vmatpush1.bf16.msra.mxu0 %v3804_v20  ;;  %3414 = vmatprep.subr.bf16.mxu1 %v3808_v23  ;;  %v3878_v20 = vld [vmem:[%s4572_s23 + $0x168] ss:$12 sps:$4 sm:$0xff]   ;;  %v382_v23 = vld [vmem:[#allocation2] sm:$0xff] }
 0x141   : > { %2592 = vmatprep.subr.bf16.mxu0 %v3811_v24  ;;  %1813 = vmatprep.mubr.bf16.mxu1 %v4698_v55  ;;  %v3846_v55 = vld [vmem:[%s4572_s23 + $0xc8] ss:$12 sps:$4 sm:$0xff]  }
 0x142   : > { %2622 = vmatprep.mubr.bf16.mxu0 %v395_v50  ;;  %v388_v24 = vld [vmem:[#allocation2 + $0x30] sm:$0xff] }
 0x143   : > { %3415 = vmatpush3.bf16.msra.mxu1 %v3812_v26  ;;  %v3883_v26 = vld [vmem:[%s4572_s23 + $0x180] ss:$12 sps:$4 sm:$0xff]  }
 0x144   : > { %2593 = vmatpush1.bf16.msra.mxu0 %v3809_v25  ;;  %3416 = vmatprep.subr.bf16.mxu1 %v3813_v27  ;;  %v3886_v25 = vld [vmem:[%s4572_s23 + $0x248] ss:$12 sps:$4 sm:$0xff]   ;;  %v385_v27 = vld [vmem:[#allocation2 + $0x18] sm:$0xff] }
 0x145   : > { %2594 = vmatprep.subr.bf16.mxu0 %v3816_v28  ;;  %v394_v28 = vpack.c.bf16 %v388_v24, %v382_v23  ;;  %v3951_v23 = vld [vmem:[%s4572_s23 + $0x440] ss:$12 sps:$4 sm:$0xff]   ;;  %v3948_v24 = vld [vmem:[%s4572_s23 + $0x2b8] ss:$12 sps:$4 sm:$0xff]  }
 0x147   : > { %3417 = vmatpush3.bf16.msra.mxu1 %v3817_v30  ;;  %v3887_v30 = vld [vmem:[%s4572_s23 + $0x188] ss:$12 sps:$4 sm:$0xff]  }
 0x148   : > { %2595 = vmatpush1.bf16.msra.mxu0 %v3814_v29  ;;  %3418 = vmatprep.subr.bf16.mxu1 %v3818_v14  ;;  %v391_v29 = vld [vmem:[#allocation2 + $0x48] sm:$0xff] }
 0x149   : > { %2596 = vmatprep.subr.bf16.mxu0 %v3821_v31  ;;  %v3890_v14 = vld [vmem:[%s4572_s23 + $0x19c] ss:$12 sps:$4 sm:$0xff]   ;;  %v3891_v31 = vld [vmem:[%s4572_s23 + $0x260] ss:$12 sps:$4 sm:$0xff]  }
 0x14b   : > { %3419 = vmatpush3.bf16.msra.mxu1 %v3822_v33  ;;  %v397_v33 = vpack.c.bf16 %v391_v29, %v385_v27  ;;  %v3956_v27 = vld [vmem:[%s4572_s23 + $0x458] ss:$12 sps:$4 sm:$0xff]  }
 0x14c   : > { %2597 = vmatpush1.bf16.msra.mxu0 %v3819_v32  ;;  %3420 = vmatprep.subr.bf16.mxu1 %v3823_v34  ;;  %v3888_v32 = vld [vmem:[%s4572_s23 + $0x198] ss:$12 sps:$4 sm:$0xff]   ;;  %v3892_v34 = vld [vmem:[%s4572_s23 + $0x1a0] ss:$12 sps:$4 sm:$0xff]  }
 0x14d   : > { %2598 = vmatprep.subr.bf16.mxu0 %v3826_v35  ;;  %v3895_v35 = vld [vmem:[%s4572_s23 + $0x1b4] ss:$12 sps:$4 sm:$0xff]   ;;  %v3957_v29 = vld [vmem:[%s4572_s23 + $0x398] ss:$12 sps:$4 sm:$0xff]  }
 0x14f   : > { %3421 = vmatpush3.bf16.msra.mxu1 %v3827_v37  ;;  %v3893_v37 = vld [vmem:[%s4572_s23 + $0x1b0] ss:$12 sps:$4 sm:$0xff]  }
 0x150   : > { %2599 = vmatpush1.bf16.msra.mxu0 %v3824_v36  ;;  %3422 = vmatprep.subr.bf16.mxu1 %v3828_v38  ;;  %v3896_v36 = vld [vmem:[%s4572_s23 + $0x278] ss:$12 sps:$4 sm:$0xff]  }
 0x151   : > { %2600 = vmatprep.subr.bf16.mxu0 %v3831_v39  ;;  %v3897_v38 = vld [vmem:[%s4572_s23 + $0x1b8] ss:$12 sps:$4 sm:$0xff]  }
 0x152   : > { %v3900_v39 = vld [vmem:[%s4572_s23 + $0x1cc] ss:$12 sps:$4 sm:$0xff]  }
 0x153   : > { %3423 = vmatpush3.bf16.msra.mxu1 %v3832_v41  ;;  %v3898_v41 = vld [vmem:[%s4572_s23 + $0x1c8] ss:$12 sps:$4 sm:$0xff]  }
 0x154   : > { %2601 = vmatpush1.bf16.msra.mxu0 %v3829_v40  ;;  %3424 = vmatprep.subr.bf16.mxu1 %v3833_v42  ;;  %v3901_v40 = vld [vmem:[%s4572_s23 + $0x290] ss:$12 sps:$4 sm:$0xff]  }
 0x155   : > { %2602 = vmatprep.subr.bf16.mxu0 %v3836_v43  ;;  %v3902_v42 = vld [vmem:[%s4572_s23 + $0x1d0] ss:$12 sps:$4 sm:$0xff]  }
 0x156   : > { %v3905_v43 = vld [vmem:[%s4572_s23 + $0x1e4] ss:$12 sps:$4 sm:$0xff]  }
 0x157   : > { %3425 = vmatpush3.bf16.msra.mxu1 %v3837_v45  ;;  %v3903_v45 = vld [vmem:[%s4572_s23 + $0x1e0] ss:$12 sps:$4 sm:$0xff]  }
 0x158   : > { %2603 = vmatpush1.bf16.msra.mxu0 %v3834_v44  ;;  %3426 = vmatprep.subr.bf16.mxu1 %v3838_v46  ;;  %v3906_v44 = vld [vmem:[%s4572_s23 + $0x2a8] ss:$12 sps:$4 sm:$0xff]  }
 0x159   : > { %2604 = vmatprep.subr.bf16.mxu0 %v3841_v47  ;;  %v3907_v46 = vld [vmem:[%s4572_s23 + $0x1e8] ss:$12 sps:$4 sm:$0xff]  }
 0x15a   : > { %v3910_v47 = vld [vmem:[%s4572_s23 + $0x1fc] ss:$12 sps:$4 sm:$0xff]  }
 0x15b   : > { %3427 = vmatpush3.bf16.msra.mxu1 %v3842_v52  ;;  %v3916_v52 = vld [vmem:[%s4572_s23 + $0x2d8] ss:$12 sps:$4 sm:$0xff]  }
 0x15c   : > { %2605 = vmatpush1.bf16.msra.mxu0 %v3839_v51  ;;  %3434 = vmatprep.subr.bf16.mxu1 %v3846_v55  ;;  %v3915_v51 = vld [vmem:[%s4572_s23 + $0x214] ss:$12 sps:$4 sm:$0xff]   ;;  %v3917_v55 = vld [vmem:[%s4572_s23 + $0x218] ss:$12 sps:$4 sm:$0xff]  }
 0x15d   : > { %2606 = vmatprep.subr.bf16.mxu0 %v3845_v53  ;;  %v3913_v53 = vld [vmem:[%s4572_s23 + $0x210] ss:$12 sps:$4 sm:$0xff]  }
 0x15e   : > { %1814 = vmatmul.mubr.bf16.vlgmr.msra.gmra.mrb[12].mxu1 %v4729_v21  ;;  %v3882_v21 = vld [vmem:[%s4572_s23 + $0xb0] ss:$12 sps:$4 sm:$0xff]  }
 0x15f   : > { %3435 = vmatpush3.bf16.msra.mxu1 %v3847_v57  ;;  %2751 = vmatprep.mubr.bf16.mxu1 %v395_v50  ;;  %v3912_v50 = vld [vmem:[%s4572_s23 + $0x200] ss:$12 sps:$4 sm:$0xff]   ;;  %v3921_v57 = vld [vmem:[%s4572_s23 + $0x2f0] ss:$12 sps:$4 sm:$0xff]  }
 0x160   : > { %2607 = vmatpush1.bf16.msra.mxu0 %v3843_v56  ;;  %3436 = vmatprep.subr.bf16.mxu1 %v3851_v59  ;;  %v3920_v56 = vld [vmem:[%s4572_s23 + $0x22c] ss:$12 sps:$4 sm:$0xff]   ;;  %v3922_v59 = vld [vmem:[%s4572_s23 + $0x230] ss:$12 sps:$4 sm:$0xff]  }
 0x161   : > { %2608 = vmatprep.subr.bf16.mxu0 %v3850_v58  ;;  %v3918_v58 = vld [vmem:[%s4572_s23 + $0x228] ss:$12 sps:$4 sm:$0xff]  }
 0x163   : > { %3437 = vmatpush3.bf16.msra.mxu1 %v3852_v61  ;;  %v384_v61 = vld [vmem:[#allocation2 + $0x10] sm:$0xff] }
 0x164   : > { %2609 = vmatpush1.bf16.msra.mxu0 %v3848_v60  ;;  %3438 = vmatprep.subr.bf16.mxu1 %v3856_v63  ;;  %v3925_v60 = vld [vmem:[%s4572_s23 + $0x244] ss:$12 sps:$4 sm:$0xff]   ;;  %v3926_v63 = vld [vmem:[%s4572_s23 + $0x3c8] ss:$12 sps:$4 sm:$0xff]  }
 0x165   : > { %2610 = vmatprep.subr.bf16.mxu0 %v3855_v62  ;;  %v390_v62 = vld [vmem:[#allocation2 + $0x40] sm:$0xff] }
 0x167   : > { %3439 = vmatpush3.bf16.msra.mxu1 %v3857_v0  ;;  %v3927_v0 = vld [vmem:[%s4572_s23 + $0x308] ss:$12 sps:$4 sm:$0xff]  }
 0x168   : > { %2611 = vmatpush1.bf16.msra.mxu0 %v3853_v54  ;;  %3440 = vmatprep.subr.bf16.mxu1 %v3861_v2  ;;  %v3923_v54 = vld [vmem:[%s4572_s23 + $0x240] ss:$12 sps:$4 sm:$0xff]  }
 0x169   : > { %2612 = vmatprep.subr.bf16.mxu0 %v3860_v1  ;;  %v4832_v1 = vpack.c.bf16 %v390_v62, %v384_v61  ;;  %v387_v2 = vld [vmem:[#allocation2 + $0x28] sm:$0xff]  ;;  %v3995_v61 = vld [vmem:[%s4572_s23 + $0x3f4] ss:$12 sps:$4 sm:$0xff]   ;;  %v3993_v62 = vld [vmem:[%s4572_s23 + $0x3f0] ss:$12 sps:$4 sm:$0xff]  }
 0x16b   : > { %3441 = vmatpush3.bf16.msra.mxu1 %v3862_v4  ;;  %v3930_v4 = vld [vmem:[%s4572_s23 + $0x25c] ss:$12 sps:$4 sm:$0xff]  }
 0x16c   : > { %2613 = vmatpush1.bf16.msra.mxu0 %v3858_v3  ;;  %3442 = vmatprep.subr.bf16.mxu1 %v3866_v6  ;;  %v393_v3 = vld [vmem:[#allocation2 + $0x58] sm:$0xff] }
 0x16d   : > { %2614 = vmatprep.subr.bf16.mxu0 %v3865_v5  ;;  %v3931_v5 = vld [vmem:[%s4572_s23 + $0x3e0] ss:$12 sps:$4 sm:$0xff]   ;;  %v4836_v6 = vpack.c.bf16 %v393_v3, %v387_v2  ;;  %v4004_v2 = vld [vmem:[%s4572_s23 + $0x43c] ss:$12 sps:$4 sm:$0xff]   ;;  %v4002_v3 = vld [vmem:[%s4572_s23 + $0x438] ss:$12 sps:$4 sm:$0xff]  }
 0x16f   : > { %3443 = vmatpush3.bf16.msra.mxu1 %v3867_v8  ;;  %v3932_v8 = vld [vmem:[%s4572_s23 + $0x320] ss:$12 sps:$4 sm:$0xff]  }
 0x170   : > { %2615 = vmatpush1.bf16.msra.mxu0 %v3863_v7  ;;  %3444 = vmatprep.subr.bf16.mxu1 %v3871_v10  ;;  %v3928_v7 = vld [vmem:[%s4572_s23 + $0x258] ss:$12 sps:$4 sm:$0xff]  }
 0x171   : > { %2616 = vmatprep.subr.bf16.mxu0 %v3870_v9  ;;  %v3935_v9 = vld [vmem:[%s4572_s23 + $0x274] ss:$12 sps:$4 sm:$0xff]   ;;  %v3936_v10 = vld [vmem:[%s4572_s23 + $0x3f8] ss:$12 sps:$4 sm:$0xff]  }
 0x173   : > { %3445 = vmatpush3.bf16.msra.mxu1 %v3872_v12  ;;  %v3937_v12 = vld [vmem:[%s4572_s23 + $0x338] ss:$12 sps:$4 sm:$0xff]  }
 0x174   : > { %2617 = vmatpush1.bf16.msra.mxu0 %v3868_v11  ;;  %3446 = vmatprep.subr.bf16.mxu1 %v3876_v15  ;;  %v3933_v11 = vld [vmem:[%s4572_s23 + $0x270] ss:$12 sps:$4 sm:$0xff]  }
 0x175   : > { %2618 = vmatprep.subr.bf16.mxu0 %v3875_v13  ;;  %v3940_v13 = vld [vmem:[%s4572_s23 + $0x28c] ss:$12 sps:$4 sm:$0xff]   ;;  %v3941_v15 = vld [vmem:[%s4572_s23 + $0x410] ss:$12 sps:$4 sm:$0xff]  }
 0x177   : > { %3447 = vmatpush3.bf16.msra.mxu1 %v3877_v17  ;;  %v3942_v17 = vld [vmem:[%s4572_s23 + $0x350] ss:$12 sps:$4 sm:$0xff]  }
 0x178   : > { %2619 = vmatpush1.bf16.msra.mxu0 %v3873_v16  ;;  %3448 = vmatprep.subr.bf16.mxu1 %v3881_v19  ;;  %v3938_v16 = vld [vmem:[%s4572_s23 + $0x288] ss:$12 sps:$4 sm:$0xff]  }
 0x179   : > { %2620 = vmatprep.subr.bf16.mxu0 %v3880_v18  ;;  %v3945_v18 = vld [vmem:[%s4572_s23 + $0x2a4] ss:$12 sps:$4 sm:$0xff]   ;;  %v3946_v19 = vld [vmem:[%s4572_s23 + $0x428] ss:$12 sps:$4 sm:$0xff]  }
 0x17b   : > { %3449 = vmatpush3.bf16.msra.mxu1 %v3882_v21  ;;  %v3947_v21 = vld [vmem:[%s4572_s23 + $0x368] ss:$12 sps:$4 sm:$0xff]  }
 0x17c   : > { %2621 = vmatpush1.bf16.msra.mxu0 %v3878_v20  ;;  %3456 = vmatprep.subr.bf16.mxu1 %v3886_v25  ;;  %v3943_v20 = vld [vmem:[%s4572_s23 + $0x2a0] ss:$12 sps:$4 sm:$0xff]  }
 0x17d   : > { %2633 = vmatprep.subr.bf16.mxu0 %v3885_v22  ;;  %v3950_v22 = vld [vmem:[%s4572_s23 + $0x2bc] ss:$12 sps:$4 sm:$0xff]   ;;  %v3952_v25 = vld [vmem:[%s4572_s23 + $0x380] ss:$12 sps:$4 sm:$0xff]  }
 0x17e   : > { %2752 = vmatmul.mubr.bf16.vlgmr.msra.gmra.mrb[16].mxu1 %v394_v28 }
 0x17f   : > { %2623 = vmatmul.mubr.bf16.vlgmr.msra.gmra.mrb[0].mxu0 %v394_v28  ;;  %3457 = vmatpush3.bf16.msra.mxu1 %v3887_v30  ;;  %v3953_v28 = vld [vmem:[%s4572_s23 + $0x2d0] ss:$12 sps:$4 sm:$0xff]   ;;  %v3960_v30 = vld [vmem:[%s4572_s23 + $0x2ec] ss:$12 sps:$4 sm:$0xff]  }
 0x180   : > { %2634 = vmatpush1.bf16.msra.mxu0 %v3883_v26  ;;  %3458 = vmatprep.subr.bf16.mxu1 %v3891_v31  ;;  %v3955_v26 = vld [vmem:[%s4572_s23 + $0x2d4] ss:$12 sps:$4 sm:$0xff]  }
 0x181   : > { %2635 = vmatprep.subr.bf16.mxu0 %v3890_v14  ;;  %2792 = vmatprep.mubr.bf16.mxu1 %v397_v33  ;;  %v3961_v14 = vld [vmem:[%s4572_s23 + $0x470] ss:$12 sps:$4 sm:$0xff]   ;;  %v3958_v31 = vld [vmem:[%s4572_s23 + $0x2e8] ss:$12 sps:$4 sm:$0xff]  }
 0x182   : > { %2665 = vmatprep.mubr.bf16.mxu0 %v397_v33  ;;  %v386_v33 = vld [vmem:[#allocation2 + $0x20] sm:$0xff] }
 0x183   : > { %3459 = vmatpush3.bf16.msra.mxu1 %v3892_v34  ;;  %v392_v34 = vld [vmem:[#allocation2 + $0x50] sm:$0xff] }
 0x184   : > { %2636 = vmatpush1.bf16.msra.mxu0 %v3888_v32  ;;  %3460 = vmatprep.subr.bf16.mxu1 %v3896_v36  ;;  %v3962_v32 = vld [vmem:[%s4572_s23 + $0x3b0] ss:$12 sps:$4 sm:$0xff]   ;;  %v4867_v36 = vpack.c.bf16 %v392_v34, %v386_v33 }
 0x185   : > { %2637 = vmatprep.subr.bf16.mxu0 %v3895_v35  ;;  %v3965_v35 = vld [vmem:[%s4572_s23 + $0x304] ss:$12 sps:$4 sm:$0xff]  }
 0x187   : > { %3461 = vmatpush3.bf16.msra.mxu1 %v3897_v38  ;;  %v3968_v38 = vld [vmem:[%s4572_s23 + $0x31c] ss:$12 sps:$4 sm:$0xff]  }
 0x188   : > { %2638 = vmatpush1.bf16.msra.mxu0 %v3893_v37  ;;  %3462 = vmatprep.subr.bf16.mxu1 %v3901_v40  ;;  %v3963_v37 = vld [vmem:[%s4572_s23 + $0x300] ss:$12 sps:$4 sm:$0xff]  }
 0x189   : > { %2639 = vmatprep.subr.bf16.mxu0 %v3900_v39  ;;  %v3966_v39 = vld [vmem:[%s4572_s23 + $0x318] ss:$12 sps:$4 sm:$0xff]   ;;  %v3971_v40 = vld [vmem:[%s4572_s23 + $0x334] ss:$12 sps:$4 sm:$0xff]  }
 0x18b   : > { %3463 = vmatpush3.bf16.msra.mxu1 %v3902_v42  ;;  %v3974_v42 = vld [vmem:[%s4572_s23 + $0x34c] ss:$12 sps:$4 sm:$0xff]  }
 0x18c   : > { %2640 = vmatpush1.bf16.msra.mxu0 %v3898_v41  ;;  %3464 = vmatprep.subr.bf16.mxu1 %v3906_v44  ;;  %v3969_v41 = vld [vmem:[%s4572_s23 + $0x330] ss:$12 sps:$4 sm:$0xff]  }
 0x18d   : > { %2641 = vmatprep.subr.bf16.mxu0 %v3905_v43  ;;  %v3972_v43 = vld [vmem:[%s4572_s23 + $0x348] ss:$12 sps:$4 sm:$0xff]   ;;  %v3977_v44 = vld [vmem:[%s4572_s23 + $0x364] ss:$12 sps:$4 sm:$0xff]  }
 0x18f   : > { %3465 = vmatpush3.bf16.msra.mxu1 %v3907_v46  ;;  %v3980_v46 = vld [vmem:[%s4572_s23 + $0x37c] ss:$12 sps:$4 sm:$0xff]  }
 0x190   : > { %2642 = vmatpush1.bf16.msra.mxu0 %v3903_v45  ;;  %3466 = vmatprep.subr.bf16.mxu1 %v3911_v48  ;;  %v3975_v45 = vld [vmem:[%s4572_s23 + $0x360] ss:$12 sps:$4 sm:$0xff]  }
 0x191   : > { %2643 = vmatprep.subr.bf16.mxu0 %v3910_v47  ;;  %v3978_v47 = vld [vmem:[%s4572_s23 + $0x378] ss:$12 sps:$4 sm:$0xff]   ;;  %v3983_v48 = vld [vmem:[%s4572_s23 + $0x394] ss:$12 sps:$4 sm:$0xff]  }
 0x193   : > { %3467 = vmatpush3.bf16.msra.mxu1 %v3912_v50 }
 0x194   : > { %2644 = vmatpush1.bf16.msra.mxu0 %v3908_v49  ;;  %3468 = vmatprep.subr.bf16.mxu1 %v3916_v52 }
 0x195   : > { %2645 = vmatprep.subr.bf16.mxu0 %v3915_v51  ;;  %v3981_v51 = vld [vmem:[%s4572_s23 + $0x390] ss:$12 sps:$4 sm:$0xff]  }
 0x197   : > { %3469 = vmatpush3.bf16.msra.mxu1 %v3917_v55 }
 0x198   : > { %2646 = vmatpush1.bf16.msra.mxu0 %v3913_v53  ;;  %3470 = vmatprep.subr.bf16.mxu1 %v3921_v57  ;;  %v3986_v53 = vld [vmem:[%s4572_s23 + $0x3ac] ss:$12 sps:$4 sm:$0xff]   ;;  %v3989_v57 = vld [vmem:[%s4572_s23 + $0x3c4] ss:$12 sps:$4 sm:$0xff]  }
 0x199   : > { %2647 = vmatprep.subr.bf16.mxu0 %v3920_v56  ;;  %v3984_v56 = vld [vmem:[%s4572_s23 + $0x3a8] ss:$12 sps:$4 sm:$0xff]  }
 0x19b   : > { %3471 = vmatpush3.bf16.msra.mxu1 %v3922_v59  ;;  %v3992_v59 = vld [vmem:[%s4572_s23 + $0x3dc] ss:$12 sps:$4 sm:$0xff]  }
 0x19c   : > { %2648 = vmatpush1.bf16.msra.mxu0 %v3918_v58  ;;  %3478 = vmatprep.subr.bf16.mxu1 %v3926_v63  ;;  %v3987_v58 = vld [vmem:[%s4572_s23 + $0x3c0] ss:$12 sps:$4 sm:$0xff]  }
 0x19d   : > { %2649 = vmatprep.subr.bf16.mxu0 %v3925_v60  ;;  %v3990_v60 = vld [vmem:[%s4572_s23 + $0x3d8] ss:$12 sps:$4 sm:$0xff]  }
 0x19e   : > { %2793 = vmatmul.mubr.bf16.vlgmr.msra.gmra.mrb[20].mxu1 %v4832_v1  ;;  %v3998_v63 = vld [vmem:[%s4572_s23 + $0x40c] ss:$12 sps:$4 sm:$0xff]  }
 0x19f   : > { %3479 = vmatpush3.bf16.msra.mxu1 %v3927_v0  ;;  %2833 = vmatprep.mubr.bf16.mxu1 %v4836_v6  ;;  %v4001_v0 = vld [vmem:[%s4572_s23 + $0x424] ss:$12 sps:$4 sm:$0xff]  }
 0x1a0   : > { %2650 = vmatpush1.bf16.msra.mxu0 %v3923_v54  ;;  %3480 = vmatprep.subr.bf16.mxu1 %v3931_v5  ;;  %v3996_v54 = vld [vmem:[%s4572_s23 + $0x408] ss:$12 sps:$4 sm:$0xff]  }
 0x1a1   : > { %2651 = vmatprep.subr.bf16.mxu0 %v3930_v4  ;;  %v4007_v4 = vld [vmem:[%s4572_s23 + $0x454] ss:$12 sps:$4 sm:$0xff]  }
 0x1a3   : > { %3481 = vmatpush3.bf16.msra.mxu1 %v3932_v8 }
 0x1a4   : > { %2652 = vmatpush1.bf16.msra.mxu0 %v3928_v7  ;;  %3482 = vmatprep.subr.bf16.mxu1 %v3936_v10  ;;  %v4005_v7 = vld [vmem:[%s4572_s23 + $0x450] ss:$12 sps:$4 sm:$0xff]   ;;  %v4010_v10 = vld [vmem:[%s4572_s23 + $0x46c] ss:$12 sps:$4 sm:$0xff]  }
 0x1a5   : > { %2653 = vmatprep.subr.bf16.mxu0 %v3935_v9 }
 0x1a7   : > { %3483 = vmatpush3.bf16.msra.mxu1 %v3937_v12 }
 0x1a8   : > { %2654 = vmatpush1.bf16.msra.mxu0 %v3933_v11  ;;  %3484 = vmatprep.subr.bf16.mxu1 %v3941_v15 }
 0x1a9   : > { %2655 = vmatprep.subr.bf16.mxu0 %v3940_v13  ;;  %v4008_v13 = vld [vmem:[%s4572_s23 + $0x468] ss:$12 sps:$4 sm:$0xff]  }
 0x1ab   : > { %3485 = vmatpush3.bf16.msra.mxu1 %v3942_v17 }
 0x1ac   : > { %2656 = vmatpush1.bf16.msra.mxu0 %v3938_v16  ;;  %3486 = vmatprep.subr.bf16.mxu1 %v3946_v19 }
 0x1ad   : > { %2657 = vmatprep.subr.bf16.mxu0 %v3945_v18 }
 0x1af   : > { %3487 = vmatpush3.bf16.msra.mxu1 %v3947_v21 }
 0x1b0   : > { %2658 = vmatpush1.bf16.msra.mxu0 %v3943_v20  ;;  %3488 = vmatprep.subr.bf16.mxu1 %v3951_v23 }
 0x1b1   : > { %2659 = vmatprep.subr.bf16.mxu0 %v3950_v22 }
 0x1b3   : > { %3489 = vmatpush3.bf16.msra.mxu1 %v3952_v25 }
 0x1b4   : > { %2660 = vmatpush1.bf16.msra.mxu0 %v3948_v24  ;;  %3490 = vmatprep.subr.bf16.mxu1 %v3956_v27 }
 0x1b5   : > { %2661 = vmatprep.subr.bf16.mxu0 %v3955_v26 }
 0x1b7   : > { %3491 = vmatpush3.bf16.msra.mxu1 %v3957_v29 }
 0x1b8   : > { %2662 = vmatpush1.bf16.msra.mxu0 %v3953_v28  ;;  %3492 = vmatprep.subr.bf16.mxu1 %v3961_v14 }
 0x1b9   : > { %2663 = vmatprep.subr.bf16.mxu0 %v3960_v30 }
 0x1bb   : > { %3493 = vmatpush3.bf16.msra.mxu1 %v3962_v32 }
 0x1bc   : > { %2664 = vmatpush1.bf16.msra.mxu0 %v3958_v31 }
 0x1bd   : > { %2676 = vmatprep.subr.bf16.mxu0 %v3965_v35 }
 0x1be   : > { %2834 = vmatmul.mubr.bf16.vlgmr.msra.gmra.mrb[24].mxu1 %v4867_v36 }
 0x1bf   : > { %2666 = vmatmul.mubr.bf16.vlgmr.msra.gmra.mrb[0].mxu0 %v4832_v1  ;;  %v3999_v1 = vld [vmem:[%s4572_s23 + $0x420] ss:$12 sps:$4 sm:$0xff]  }
 0x1c0   : > { %2677 = vmatpush1.bf16.msra.mxu0 %v3963_v37  ;;  %2708 = vmatprep.mubr.bf16.mxu0 %v4836_v6 }
 0x1c1   : > { %2678 = vmatprep.subr.bf16.mxu0 %v3968_v38 }
 0x1c4   : > { %2679 = vmatpush1.bf16.msra.mxu0 %v3966_v39 }
 0x1c5   : > { %2680 = vmatprep.subr.bf16.mxu0 %v3971_v40 }
 0x1c8   : > { %2681 = vmatpush1.bf16.msra.mxu0 %v3969_v41 }
 0x1c9   : > { %2682 = vmatprep.subr.bf16.mxu0 %v3974_v42 }
 0x1cc   : > { %2683 = vmatpush1.bf16.msra.mxu0 %v3972_v43 }
 0x1cd   : > { %2684 = vmatprep.subr.bf16.mxu0 %v3977_v44 }
 0x1d0   : > { %2685 = vmatpush1.bf16.msra.mxu0 %v3975_v45 }
 0x1d1   : > { %2686 = vmatprep.subr.bf16.mxu0 %v3980_v46  ;;  %v4884_v49 = vpop.f32.mrb[0].mxu1  ;;  %v2844_v46 = vlaneseq }
 0x1d2   : > { %v4886_v50 = vpop.f32.mrb[1].mxu1 }
 0x1d3   : > { %v4889_v52 = vpop.f32.mrb[2].mxu1 }
 0x1d4   : > { %2687 = vmatpush1.bf16.msra.mxu0 %v3978_v47  ;;  %v4892_v55 = vpop.f32.mrb[3].mxu1  ;;  %v2845_v47 = vshrl.u32 %v2844_v46, 7 }
 0x1d5   : > { %2688 = vmatprep.subr.bf16.mxu0 %v3983_v48 }
 0x1d6   : > { %v2854_v48 = vsub.s32 2, %v2845_v47 }
 0x1d8   : > { %2689 = vmatpush1.bf16.msra.mxu0 %v3981_v51  ;;  %v2842_v51 = vld [vmem:[%s337_s28] sm:$0x7] }
 0x1d9   : > { %2690 = vmatprep.subr.bf16.mxu0 %v3986_v53 }
 0x1dc   : > { %2691 = vmatpush1.bf16.msra.mxu0 %v3984_v56 }
 0x1dd   : > { %2692 = vmatprep.subr.bf16.mxu0 %v3989_v57 }
 0x1e0   : > { %2693 = vmatpush1.bf16.msra.mxu0 %v3987_v58  ;;  %v2855_v58 = vrot.slane %v2842_v51, %v2854_v48 }
 0x1e1   : > { %2694 = vmatprep.subr.bf16.mxu0 %v3992_v59 }
 0x1e4   : > { %2695 = vmatpush1.bf16.msra.mxu0 %v3990_v60 }
 0x1e5   : > { %2696 = vmatprep.subr.bf16.mxu0 %v3995_v61 }
 0x1e8   : > { %2697 = vmatpush1.bf16.msra.mxu0 %v3993_v62 }
 0x1e9   : > { %2698 = vmatprep.subr.bf16.mxu0 %v3998_v63 }
 0x1ec   : > { %2699 = vmatpush1.bf16.msra.mxu0 %v3996_v54 }
 0x1ed   : > { %2700 = vmatprep.subr.bf16.mxu0 %v4001_v0 }
 0x1f0   : > { %2701 = vmatpush1.bf16.msra.mxu0 %v3999_v1 }
 0x1f1   : > { %2702 = vmatprep.subr.bf16.mxu0 %v4004_v2  ;;  %v3384_v5 = vpop.f32.mrb[4].mxu1 }
 0x1f2   : > { %v3385_v6 = vpop.f32.mrb[5].mxu1 }
 0x1f3   : > { %v3386_v8 = vadd.f32 %v3385_v6, %v3384_v5  ;;  %v3387_v9 = vpop.f32.mrb[6].mxu1 }
 0x1f4   : > { %2703 = vmatpush1.bf16.msra.mxu0 %v4002_v3  ;;  %v3388_v11 = vpop.f32.mrb[7].mxu1  ;;  %v2846_v3 = vsub.s32 0, %v2845_v47 }
 0x1f5   : > { %2704 = vmatprep.subr.bf16.mxu0 %v4007_v4  ;;  %v3389_v12 = vadd.f32 %v3388_v11, %v3387_v9  ;;  %v2850_v4 = vsub.s32 1, %v2845_v47 }
 0x1f6   : > { %v2847_v5 = vrot.slane %v2842_v51, %v2846_v3 }
 0x1f8   : > { %2705 = vmatpush1.bf16.msra.mxu0 %v4005_v7  ;;  %v2851_v7 = vrot.slane %v2842_v51, %v2850_v4 }
 0x1f9   : > { %2706 = vmatprep.subr.bf16.mxu0 %v4010_v10 }
 0x1fc   : > { %2707 = vmatpush1.bf16.msra.mxu0 %v4008_v13 }
 0x1ff   : > { %2709 = vmatmul.mubr.bf16.vlgmr.msra.gmra.mrb[0].mxu0 %v4867_v36 }
 0x211   : > { %v3406_v15 = vpop.f32.mrb[8].mxu1 }
 0x212   : > { %v3407_v16 = vpop.f32.mrb[9].mxu1 }
 0x213   : > { %v3408_v17 = vadd.f32 %v3407_v16, %v3406_v15  ;;  %v3409_v18 = vpop.f32.mrb[10].mxu1 }
 0x214   : > { %v3410_v19 = vpop.f32.mrb[11].mxu1 }
 0x215   : > { %v1775_v20 = vadd.f32 %v3408_v17, %v3386_v8  ;;  %v3411_v21 = vadd.f32 %v3410_v19, %v3409_v18 }
 0x217   : > { %v1778_v22 = vadd.f32 %v3411_v21, %v3389_v12 }
 0x231   : > { %v3428_v23 = vpop.f32.mrb[12].mxu1 }
 0x232   : > { %v3429_v24 = vpop.f32.mrb[13].mxu1 }
 0x233   : > { %v3430_v25 = vadd.f32 %v3429_v24, %v3428_v23  ;;  %v3431_v26 = vpop.f32.mrb[14].mxu1 }
 0x234   : > { %v3432_v27 = vpop.f32.mrb[15].mxu1 }
 0x235   : > { %v1816_v28 = vadd.f32 %v3430_v25, %v1775_v20  ;;  %v3433_v29 = vadd.f32 %v3432_v27, %v3431_v26 }
 0x237   : > { %v1819_v30 = vadd.f32 %v3433_v29, %v1778_v22 }
 0x251   : > { %v3450_v14 = vpop.f32.mrb[16].mxu1 }
 0x252   : > { %v3451_v31 = vpop.f32.mrb[17].mxu1 }
 0x253   : > { %v3452_v32 = vadd.f32 %v3451_v31, %v3450_v14  ;;  %v3453_v33 = vpop.f32.mrb[18].mxu1 }
 0x254   : > { %v3454_v34 = vpop.f32.mrb[19].mxu1 }
 0x255   : > { %v2754_v35 = vadd.f32 %v3452_v32, %v1816_v28  ;;  %v3455_v36 = vadd.f32 %v3454_v34, %v3453_v33 }
 0x257   : > { %v2757_v37 = vadd.f32 %v3455_v36, %v1819_v30 }
 0x271   : > { %v3472_v38 = vpop.f32.mrb[20].mxu1 }
 0x272   : > { %v3473_v39 = vpop.f32.mrb[21].mxu1 }
 0x273   : > { %v3474_v40 = vadd.f32 %v3473_v39, %v3472_v38  ;;  %v3475_v41 = vpop.f32.mrb[22].mxu1 }
 0x274   : > { %v3476_v42 = vpop.f32.mrb[23].mxu1 }
 0x275   : > { %v2795_v43 = vadd.f32 %v3474_v40, %v2754_v35  ;;  %v3477_v44 = vadd.f32 %v3476_v42, %v3475_v41 }
 0x277   : > { %v2798_v45 = vadd.f32 %v3477_v44, %v2757_v37 }
 0x291   : > { %v3494_v53 = vpop.f32.mrb[24].mxu1 }
 0x292   : > { %v3495_v56 = vpop.f32.mrb[25].mxu1 }
 0x293   : > { %v3496_v57 = vadd.f32 %v3495_v56, %v3494_v53  ;;  %v3497_v59 = vpop.f32.mrb[26].mxu1 }
 0x294   : > { %v3498_v60 = vpop.f32.mrb[27].mxu1 }
 0x295   : > { %v2836_v61 = vadd.f32 %v3496_v57, %v2795_v43  ;;  %v3499_v62 = vadd.f32 %v3498_v60, %v3497_v59 }
 0x297   : > { %v2861_v63 = vadd.f32 %v2855_v58, %v2836_v61  ;;  %v2839_v54 = vadd.f32 %v3499_v62, %v2798_v45 }
 0x299   : > { %v3364_v0 = vpack.c.bf16 %v2861_v63, %v2861_v63  ;;  %v2864_v1 = vadd.f32 %v2855_v58, %v2839_v54 }
 0x29b   : > { %2886 = vst [vmem:[%s373_s11 + $0x8] sm:$0xf] %v3364_v0  ;;  %v3366_v2 = vpack.c.bf16 %v2864_v1, %v2864_v1 }
 0x29d   : > { %2888 = vst [vmem:[%s373_s11 + $0x14] sm:$0xf] %v3366_v2 }
 0x2d2   : > { %v2710_v6 = vpop.f32.mrb[0].mxu0 }
 0x2d3   : > { %v3500_v8 = vadd.f32 %v2710_v6, %v4884_v49  ;;  %v2712_v9 = vpop.f32.mrb[1].mxu0 }
 0x2d4   : > { %v3501_v10 = vadd.f32 %v2712_v9, %v4886_v50  ;;  %v2714_v11 = vpop.f32.mrb[2].mxu0 }
 0x2d5   : > { %v2859_v12 = vadd.f32 %v3500_v8, %v2847_v5  ;;  %v3502_v13 = vadd.f32 %v2714_v11, %v4889_v52  ;;  %v2716_v15 = vpop.f32.mrb[3].mxu0 }
 0x2d6   : > { %v2860_v16 = vadd.f32 %v3501_v10, %v2851_v7  ;;  %v3503_v17 = vadd.f32 %v2716_v15, %v4892_v55 }
 0x2d7   : > { %v2862_v18 = vadd.f32 %v3502_v13, %v2847_v5 }
 0x2d8   : > { %v3363_v49 = vpack.c.bf16 %v2860_v16, %v2859_v12  ;;  %v2863_v50 = vadd.f32 %v3503_v17, %v2851_v7 }
 0x2da   : > { %2885 = vst [vmem:[%s373_s11] sm:$0xff] %v3363_v49  ;;  %v3365_v52 = vpack.c.bf16 %v2863_v50, %v2862_v18 }
 0x2dc   : > { %2887 = vst [vmem:[%s373_s11 + $0xc] sm:$0xff] %v3365_v52 }
 0x2dd   : > { %4170 = shalt.err (!%p4167_p10)
}
 0x2de   : > { %s4171_s15 = scalar_lea.hbm %s4924_s8, 384  ;;  %s4175_s18 = scalar_lea.hbm %s4978_s5, 768 }
 0x2df   : > { %p4172_p3 = scmp.ne.s32.totalorder %s4924_s8, %s4171_s15  ;;  %p4176_p0 = scmp.lt.u32.totalorder %s4924_s8, %s4978_s5 }
 0x2e0   : > { %p4177_p6 = scmp.lt.u32.totalorder %s4175_s18, %s4171_s15  ;;  %p4179_p11 = scmp.lt.u32.totalorder %s4171_s15, %s4924_s8 }
 0x2e1   : > { %p4173_p8 = pnand %p4172_p3, %p5036_p13 }
 0x2e2   : > { %p4178_p2 = por %p4177_p6, %p4176_p0 }
 0x2e3   : > { %p4174_p9 = pneg %p4173_p8 }
 0x2e4   : > { %p4180_p1 = por %p4179_p11, %p4178_p2 }
 0x2e6   : > { %p4181_p5 = pnand %p4180_p1, %p4174_p9 }
 0x2e8   : > { %4184 = shalt.err (!%p4181_p5)
}
 0x2e9   : > { %s4260_s30 = smov 192   ;;  %s4261_s23 = smov 384  }
 0x2ea   : > { %s4262_s12 = smov 12  }
 0x2eb   : > { %3540 = dma.vmem_to_hbm [thread:$0]  (%p5036_p13), %s4919_s25, 384, %s4924_s8, %s2890_s21, %s4260_s30, %s4261_s23, %s4262_s12  }
 0x2ec PF: > { %s5037_s24 = sld [smem:[#allocation15_spill]]  ;;  %s5038_s28 = sld [smem:[#allocation17_spill]] }
 0x2ed   : > { %s5039_s26 = sld [smem:[#allocation16_spill]] }
 0x2f2   : > { %s2921_s11 = sand.u32 1, %s5037_s24   ;;  %p5040_p4 = scmp.ne.s32.totalorder %s5038_s28, 0 }
 0x2f3   : > { %p5041_p12 = scmp.ge.s32.totalorder %s5039_s26, 2  ;;  %s2922_s17 = scalar_lea.sflag [#allocation4], %s2921_s11 }
 0x2f5   : > { %p3560_p7 = pnand %p5041_p12, %p5040_p4 }
 0x2f7   : > { %4222 = dma.done.wait (!%p3560_p7), %s2922_s17, 384  }
 0x2f8   : > { %4224 = vsyncadd (!%p3560_p7), %s2922_s17, 4294966912  ;;  %s20_s23 = sadd.s32 1, %s5039_s26   ;;  %s5042_s7 = sld [smem:[#allocation19_spill]] }
 0x2f9   : > { %p17_p10 = scmp.ge.s32.totalorder %s20_s23, 4   ;;  %s5043_s29 = sld [smem:[#allocation18_spill]] }
 0x2fa   : > { %s5044_s18 = smov %s4231_s19  ;;  %s5045_s19 = smov %s4235_s20 }
 0x2fb   : > { %s5047_s21 = smov %s4243_s22  ;;  %19 = sbr.rel (!%p17_p10) target bundleno = 10 (0xa), region = 116 }
 0x2fe   : > { %s5046_s20 = smov %s5042_s7 }
 0x2ff   : > { %s5048_s22 = smov %s5043_s29 }
 0x302   :  { %2927 = vsyncpa [#allocation3], 1 }
 0x303   :  { %2929 = vsyncpa [#allocation3 + $0x1], 1 }
 0x304   :  { %2930 = vsyncpa [#allocation6], 1 }
 0x305   :  { %2931 = vsyncpa [#allocation4], 1 }
 0x306   :  { %2933 = vsyncpa [#allocation4 + $0x1], 1 }

</bundles_post_ra>
